<compile_context>
chip_gen: v7x
topology: tpu7x:2x2x1
jax: 0.10.0
libtpu: 0.0.40
codegen_flags: <defaults>
</compile_context>

<pallas_src>
import jax
import jax.numpy as jnp
import numpy as np
from jax.experimental import pallas as pl
from jax.experimental.pallas import tpu as pltpu

DIM = 32  # the `dim` global used by the PyTorch module


# --------------------------------------------------------------------------- #
# Pallas kernel                                                               #
# --------------------------------------------------------------------------- #
def nas_gnn_kernel(x_ref, a_ref, p_ref,
                   w0c_ref, b0c_ref,
                   wcat_ref, bcat_ref,
                   gcat_ref, betac_ref,
                   wlin_ref, blinc_ref,
                   w2c_ref, b2_ref,
                   o_ref):
    N = a_ref.shape[0]
    D2 = w0c_ref.shape[1]          # 2 * dim (branch-1 lanes | branch-2 lanes)
    D = D2 // 2
    B, LANES = o_ref.shape         # graphs per mega-batch, lane-padded output width

    x = x_ref[...]                 # [N, 1]   f32 raw node features
    A = a_ref[...]                 # [N, N]   bf16 dense weighted adjacency (dst, src)

    # Static lane mask: lanes [0, D) belong to branch 1, [D, 2D) to branch 2.
    lane = jax.lax.broadcasted_iota(jnp.int32, (1, D2), 1)
    is_b1 = lane < D               # [1, 2D] bool

    gamma = gcat_ref[...]          # [1, 2D]  (gamma of norm | gamma of norm2)
    beta = betac_ref[...]          # [1, 2D]
    inv_n = 1.0 / N

    def bn(h):
        # Single-pass BatchNorm1d over the node axis, per lane, folded into one FMA.
        mu = jnp.sum(h, axis=0, keepdims=True) * inv_n
        ex2 = jnp.sum(h * h, axis=0, keepdims=True) * inv_n
        var = jnp.maximum(ex2 - mu * mu, 0.0)
        scale = gamma * jax.lax.rsqrt(var + 1e-5)
        shift = beta - mu * scale
        return h * scale + shift

    def relu(v):
        return jnp.maximum(v, 0.0)

    def leaky(v):
        return jnp.where(v > 0, v, 0.01 * v)

    def conv(h_bf, k):
        # K=128 fused GraphConv for both branches:
        #   Ah = A @ h                       (contraction K = N = 128)
        #   z  = [h ‖ Ah] @ Wcat[k] + b      (contraction K = 4D = 128)
        # Wcat[k] = [[blkdiag(Wself_b1, Wself_b2)], [blkdiag(Wnbr_b1, Wnbr_b2)]]
        # Output is naturally a 64-lane array -> no mid-vreg lane slicing.
        ah = jnp.dot(A, h_bf, preferred_element_type=jnp.float32)          # [N, 2D] f32
        hc = jnp.concatenate([h_bf, ah.astype(jnp.bfloat16)], axis=1)      # [N, 4D] bf16
        z = jnp.dot(hc, wcat_ref[k], preferred_element_type=jnp.float32)   # [N, 2D] f32
        return z + bcat_ref[k]

    # lin0: Linear(1, dim) + ReLU, lane-duplicated so both branches share it.
    h_bf = relu(x * w0c_ref[...] + b0c_ref[...]).astype(jnp.bfloat16)      # [N, 2D]

    # step 0: conv1 (ReLU)  | conv4 (LeakyReLU), then norm | norm2
    z = conv(h_bf, 0)
    h_bf = bn(jnp.where(is_b1, relu(z), leaky(z))).astype(jnp.bfloat16)
    # step 1: conv2 (Tanh)  | conv5 (ReLU)
    z = conv(h_bf, 1)
    h_bf = bn(jnp.where(is_b1, jnp.tanh(z), relu(z))).astype(jnp.bfloat16)
    # step 2: conv3 (ReLU)  | conv6 (Tanh)
    z = conv(h_bf, 2)
    h_bf = bn(jnp.where(is_b1, relu(z), jnp.tanh(z))).astype(jnp.bfloat16)

    # Pooling: P is [2B, N] with rows [0:B) = add-pool, [B:2B) = mean-pool.
    ph = jnp.dot(p_ref[...], h_bf, preferred_element_type=jnp.float32)     # [2B, 2D]
    # Branch 1 keeps its add-pooled lanes, branch 2 its mean-pooled lanes.
    pcat = jnp.where(is_b1, ph[:B, :], ph[B:, :])                          # [B, 2D]

    # lin1 | lin12 as one block-diagonal matmul + ReLU.
    o = relu(jnp.dot(pcat.astype(jnp.bfloat16), wlin_ref[...],
                     preferred_element_type=jnp.float32) + blinc_ref[...])  # [B, 2D]

    # aggr_type == 'sum': lin2(o1 + o2) == sum(o * [w2 | w2]) + b2.
    res = jnp.sum(o * w2c_ref[...], axis=1, keepdims=True) + b2_ref[...]    # [B, 1]

    # Lane-dense, unmasked full-tile store; host reads lane 0 of each row.
    o_ref[...] = jnp.broadcast_to(res, (B, LANES))


# --------------------------------------------------------------------------- #
# Host-side parameter prep / wrapper                                          #
# --------------------------------------------------------------------------- #
def make_params(key, dim=DIM):
    keys = jax.random.split(key, 10)
    scale = 0.1
    return {
        "w0":    scale * jax.random.normal(keys[0], (1, dim), jnp.float32),
        "b0":    scale * jax.random.normal(keys[1], (1, dim), jnp.float32),
        "wself": scale * jax.random.normal(keys[2], (6, dim, dim), jnp.float32),
        "wnbr":  scale * jax.random.normal(keys[3], (6, dim, dim), jnp.float32),
        "bconv": scale * jax.random.normal(keys[4], (6, 1, dim), jnp.float32),
        "gamma": jnp.ones((2, 1, dim), jnp.float32),
        "beta":  jnp.zeros((2, 1, dim), jnp.float32),
        "wlin":  scale * jax.random.normal(keys[5], (2, dim, dim), jnp.float32),
        "blin":  scale * jax.random.normal(keys[6], (2, 1, dim), jnp.float32),
        "w2":    scale * jax.random.normal(keys[7], (1, dim), jnp.float32),
        "b2":    scale * jax.random.normal(keys[8], (1, 1), jnp.float32),
    }


def _blkdiag(a, b):
    za = jnp.zeros((a.shape[0], b.shape[1]), a.dtype)
    zb = jnp.zeros((b.shape[0], a.shape[1]), b.dtype)
    return jnp.concatenate(
        [jnp.concatenate([a, za], axis=1),
         jnp.concatenate([zb, b], axis=1)], axis=0)


def fuse_params(params, mxu_dtype=jnp.bfloat16):
    """Build lane-fused / block-diagonal weights host-side (free); MXU weights in bf16,
    BN / bias path in f32.  Wcat[k] is [4D, 2D] so conv is [h ‖ Ah] @ Wcat (K=128)."""
    w0c = jnp.concatenate([params["w0"], params["w0"]], axis=1)            # [1, 2D]
    b0c = jnp.concatenate([params["b0"], params["b0"]], axis=1)            # [1, 2D]

    wcat, bcat = [], []
    for k in range(3):
        wself_blk = _blkdiag(params["wself"][k], params["wself"][k + 3])   # [2D, 2D]
        wnbr_blk = _blkdiag(params["wnbr"][k], params["wnbr"][k + 3])      # [2D, 2D]
        wcat.append(jnp.concatenate([wself_blk, wnbr_blk], axis=0))        # [4D, 2D]
        bcat.append(jnp.concatenate([params["bconv"][k],
                                     params["bconv"][k + 3]], axis=1))     # [1, 2D]
    wcat = jnp.stack(wcat).astype(mxu_dtype)                               # [3, 4D, 2D]
    bcat = jnp.stack(bcat)                                                 # [3, 1, 2D]

    gcat = jnp.concatenate([params["gamma"][0], params["gamma"][1]], axis=1)
    betac = jnp.concatenate([params["beta"][0], params["beta"][1]], axis=1)
    wlin = _blkdiag(params["wlin"][0], params["wlin"][1]).astype(mxu_dtype)
    blinc = jnp.concatenate([params["blin"][0], params["blin"][1]], axis=1)
    w2c = jnp.concatenate([params["w2"], params["w2"]], axis=1)

    return dict(w0c=w0c, b0c=b0c, wcat=wcat, bcat=bcat, gcat=gcat,
                betac=betac, wlin=wlin, blinc=blinc, w2c=w2c, b2=params["b2"])


def _const_spec(shape):
    nd = len(shape)
    return pl.BlockSpec(shape, lambda g, _nd=nd: (0,) * _nd)


@jax.jit
def nas_gnn_forward(x, adj, p_add, p_mean, fused):
    """x: [G, N, 1], adj: [G, N, N], p_add/p_mean: [G, B, N].  Returns [G*B] scores."""
    G, N, _ = x.shape
    B = p_add.shape[1]
    D2 = fused["w0c"].shape[1]
    LANES = 128

    a_bf16 = adj.astype(jnp.bfloat16)
    # Stack both pooling operators so a single [2B, N] @ [N, 2D] matmul pools both
    # branches; the kernel lane-selects the right half of each.
    p_cat = jnp.concatenate([p_add, p_mean], axis=1).astype(jnp.bfloat16)   # [G, 2B, N]

    weights = (fused["w0c"], fused["b0c"], fused["wcat"], fused["bcat"],
               fused["gcat"], fused["betac"], fused["wlin"], fused["blinc"],
               fused["w2c"], fused["b2"])

    in_specs = [
        pl.BlockSpec((None, N, 1), lambda g: (g, 0, 0)),          # x  (per-batch block)
        pl.BlockSpec((None, N, N), lambda g: (g, 0, 0)),          # A  (per-batch block)
        pl.BlockSpec((None, 2 * B, N), lambda g: (g, 0, 0)),      # P  (per-batch block)
    ] + [_const_spec(w.shape) for w in weights]                   # weights: resident

    out_specs = pl.BlockSpec((None, B, LANES), lambda g: (g, 0, 0))

    # Advisory cost estimate so XLA can schedule/overlap this small custom call.
    flops_step = (3 * (2 * N * N * D2 + 4 * N * D2 * D2)          # 3 x (A@h + hc@Wcat)
                  + 2 * (2 * B) * N * D2 + 2 * B * D2 * D2)       # pooling + lin
    trans_step = 2 * N * (D2 // 2) + 8 * D2                       # tanh + rsqrt (approx)
    io_step = N * 4 + N * N * 2 + 2 * B * N * 2 + B * LANES * 4
    w_bytes = sum(int(np.prod(w.shape)) * w.dtype.itemsize for w in weights)

    slab = pl.pallas_call(
        nas_gnn_kernel,
        out_shape=jax.ShapeDtypeStruct((G, B, LANES), jnp.float32),
        grid=(G,),
        in_specs=in_specs,
        out_specs=out_specs,
        compiler_params=pltpu.CompilerParams(
            dimension_semantics=("parallel",)),
        cost_estimate=pl.CostEstimate(
            flops=int(G * flops_step),
            transcendentals=int(G * trans_step),
            bytes_accessed=int(G * io_step + w_bytes)),
    )(x, a_bf16, p_cat, *weights)

    # Lane 0 of each row holds the graph's score; matches `out.view(-1)` in PyTorch.
    return slab[:, :, 0].reshape(-1)


# --------------------------------------------------------------------------- #
# Pure-JAX reference (unfused, f32) for correctness checking                  #
# --------------------------------------------------------------------------- #
def nas_gnn_reference(x, adj, p_add, p_mean, params):
    relu = lambda v: jnp.maximum(v, 0.0)
    leaky = lambda v: jnp.where(v > 0, v, 0.01 * v)

    def one_batch(xg, ag, pag, pmg):
        def conv(h, k):
            return (h @ params["wself"][k] + (ag @ h) @ params["wnbr"][k]
                    + params["bconv"][k])

        def bn(h, n):
            mu = jnp.mean(h, axis=0, keepdims=True)
            var = jnp.mean((h - mu) ** 2, axis=0, keepdims=True)
            return ((h - mu) * jax.lax.rsqrt(var + 1e-5) * params["gamma"][n]
                    + params["beta"][n])

        h0 = relu(xg * params["w0"] + params["b0"])

        h = bn(relu(conv(h0, 0)), 0)
        h = bn(jnp.tanh(conv(h, 1)), 0)
        h = bn(relu(conv(h, 2)), 0)
        o1 = relu((pag @ h) @ params["wlin"][0] + params["blin"][0])

        g = bn(leaky(conv(h0, 3)), 1)
        g = bn(relu(conv(g, 4)), 1)
        g = bn(jnp.tanh(conv(g, 5)), 1)
        o2 = relu((pmg @ g) @ params["wlin"][1] + params["blin"][1])

        s = o1 + o2
        return (jnp.sum(s * params["w2"], axis=1, keepdims=True)
                + params["b2"]).reshape(-1)

    return jnp.concatenate([one_batch(x[g], adj[g], p_add[g], p_mean[g])
                            for g in range(x.shape[0])])


# --------------------------------------------------------------------------- #
# Deterministic example data                                                  #
# --------------------------------------------------------------------------- #
def make_graph_data(key, num_batches=2, graphs_per_batch=8, nodes_per_graph=16):
    """G mega-batches of B ring graphs (16 nodes each, weighted edges) -> N=128/batch."""
    N = graphs_per_batch * nodes_per_graph
    x = jax.random.normal(key, (num_batches, N, 1), jnp.float32)   # data.x

    adj = np.zeros((num_batches, N, N), dtype=np.float32)          # A[dst, src]
    p_add = np.zeros((num_batches, graphs_per_batch, N), dtype=np.float32)
    for gb in range(num_batches):
        for b in range(graphs_per_batch):
            base = b * nodes_per_graph
            for i in range(nodes_per_graph):
                a = base + i
                c = base + (i + 1) % nodes_per_graph
                attr = 0.5 + 0.05 * ((i + b + gb) % 7)             # data.edge_attr
                adj[gb, c, a] += attr
                adj[gb, a, c] += attr
            p_add[gb, b, base:base + nodes_per_graph] = 1.0        # data.batch
    p_mean = p_add / p_add.sum(axis=2, keepdims=True)

    return x, jnp.asarray(adj), jnp.asarray(p_add), jnp.asarray(p_mean)


if __name__ == "__main__":
    key = jax.random.PRNGKey(0)
    k_data, k_param = jax.random.split(key)

    # 2 mega-batches x (8 graphs x 16 nodes) -> N = 128 per batch, hidden dim = 32.
    G, B, NPG = 2, 8, 16
    x, adj, p_add, p_mean = make_graph_data(k_data, G, B, NPG)
    params = make_params(k_param, DIM)
    fused = fuse_params(params)

    out = nas_gnn_forward(x, adj, p_add, p_mean, fused)
    out = jax.block_until_ready(out)

    assert out.shape == (G * B,), out.shape
    assert bool(jnp.all(jnp.isfinite(out)))

    # Check against the unfused f32 reference (bf16 matmuls -> loose tolerance).
    ref = nas_gnn_reference(x, adj, p_add, p_mean, params)
    err = float(jnp.max(jnp.abs(out - ref)))
    tol = 0.05 + 0.1 * float(jnp.max(jnp.abs(ref)))
    assert err <= tol, (err, tol)

    print("KERNEL_OK")
</pallas_src>

<mosaic_0001>
module attributes {stable_mosaic.version = 11 : i64} {
  func.func @nas_gnn_kernel(%arg0: i32, %arg1: memref<1x128x1xf32, #tpu.memory_space<vmem>>, %arg2: memref<1x128x128xbf16, #tpu.memory_space<vmem>>, %arg3: memref<1x16x128xbf16, #tpu.memory_space<vmem>>, %arg4: memref<1x64xf32, #tpu.memory_space<vmem>>, %arg5: memref<1x64xf32, #tpu.memory_space<vmem>>, %arg6: memref<3x128x64xbf16, #tpu.memory_space<vmem>>, %arg7: memref<3x1x64xf32, #tpu.memory_space<vmem>>, %arg8: memref<1x64xf32, #tpu.memory_space<vmem>>, %arg9: memref<1x64xf32, #tpu.memory_space<vmem>>, %arg10: memref<64x64xbf16, #tpu.memory_space<vmem>>, %arg11: memref<1x64xf32, #tpu.memory_space<vmem>>, %arg12: memref<1x64xf32, #tpu.memory_space<vmem>>, %arg13: memref<1x1xf32, #tpu.memory_space<vmem>>, %arg14: memref<1x8x128xf32, #tpu.memory_space<vmem>>) attributes {dimension_semantics = [#tpu.dimension_semantics<parallel>], iteration_bounds = array<i64: 2>, scalar_prefetch = 0 : i64, scratch_operands = 0 : i64, tpu.core_type = #tpu.core_type<tc>, window_params = [{transform_indices = @transform_0, window_bounds = array<i64: 1, 128, 1>}, {transform_indices = @transform_1, window_bounds = array<i64: 1, 128, 128>}, {transform_indices = @transform_2, window_bounds = array<i64: 1, 16, 128>}, {pipeline_mode = #tpu.pipeline_mode<synchronous>, transform_indices = @transform_3, window_bounds = array<i64: 1, 64>}, {pipeline_mode = #tpu.pipeline_mode<synchronous>, transform_indices = @transform_4, window_bounds = array<i64: 1, 64>}, {pipeline_mode = #tpu.pipeline_mode<synchronous>, transform_indices = @transform_5, window_bounds = array<i64: 3, 128, 64>}, {pipeline_mode = #tpu.pipeline_mode<synchronous>, transform_indices = @transform_6, window_bounds = array<i64: 3, 1, 64>}, {pipeline_mode = #tpu.pipeline_mode<synchronous>, transform_indices = @transform_7, window_bounds = array<i64: 1, 64>}, {pipeline_mode = #tpu.pipeline_mode<synchronous>, transform_indices = @transform_8, window_bounds = array<i64: 1, 64>}, {pipeline_mode = #tpu.pipeline_mode<synchronous>, transform_indices = @transform_9, window_bounds = array<i64: 64, 64>}, {pipeline_mode = #tpu.pipeline_mode<synchronous>, transform_indices = @transform_10, window_bounds = array<i64: 1, 64>}, {pipeline_mode = #tpu.pipeline_mode<synchronous>, transform_indices = @transform_11, window_bounds = array<i64: 1, 64>}, {pipeline_mode = #tpu.pipeline_mode<synchronous>, transform_indices = @transform_12, window_bounds = array<i64: 1, 1>}, {transform_indices = @transform_13, window_bounds = array<i64: 1, 8, 128>}]} {
    %c0 = arith.constant 0 : index
    %c0_0 = arith.constant 0 : index
    %c0_1 = arith.constant 0 : index
    %0 = vector.load %arg1[%c0, %c0_0, %c0_1] : memref<1x128x1xf32, #tpu.memory_space<vmem>>, vector<1x128x1xf32>
    %1 = vector.shape_cast %0 : vector<1x128x1xf32> to vector<128x1xf32>
    %c0_2 = arith.constant 0 : index
    %c0_3 = arith.constant 0 : index
    %c0_4 = arith.constant 0 : index
    %2 = vector.load %arg2[%c0_2, %c0_3, %c0_4] : memref<1x128x128xbf16, #tpu.memory_space<vmem>>, vector<1x128x128xbf16>
    %3 = vector.shape_cast %2 : vector<1x128x128xbf16> to vector<128x128xbf16>
    %4 = tpu.iota {dimensions = array<i32: 1>} : vector<1x64xi32>
    %c32_i32 = arith.constant 32 : i32
    %5 = vector.broadcast %c32_i32 : i32 to vector<1x64xi32>
    %6 = arith.cmpi slt, %4, %5 : vector<1x64xi32>
    %c0_5 = arith.constant 0 : index
    %c0_6 = arith.constant 0 : index
    %7 = vector.load %arg8[%c0_5, %c0_6] : memref<1x64xf32, #tpu.memory_space<vmem>>, vector<1x64xf32>
    %c0_7 = arith.constant 0 : index
    %c0_8 = arith.constant 0 : index
    %8 = vector.load %arg9[%c0_7, %c0_8] : memref<1x64xf32, #tpu.memory_space<vmem>>, vector<1x64xf32>
    %c0_9 = arith.constant 0 : index
    %c0_10 = arith.constant 0 : index
    %9 = vector.load %arg4[%c0_9, %c0_10] : memref<1x64xf32, #tpu.memory_space<vmem>>, vector<1x64xf32>
    %10 = vector.broadcast %1 : vector<128x1xf32> to vector<128x64xf32>
    %11 = vector.broadcast %9 : vector<1x64xf32> to vector<128x64xf32>
    %12 = arith.mulf %10, %11 : vector<128x64xf32>
    %c0_11 = arith.constant 0 : index
    %c0_12 = arith.constant 0 : index
    %13 = vector.load %arg5[%c0_11, %c0_12] : memref<1x64xf32, #tpu.memory_space<vmem>>, vector<1x64xf32>
    %14 = vector.broadcast %13 : vector<1x64xf32> to vector<128x64xf32>
    %15 = arith.addf %12, %14 : vector<128x64xf32>
    %cst = arith.constant 0.000000e+00 : f32
    %16 = vector.broadcast %cst : f32 to vector<128x64xf32>
    %17 = arith.maximumf %15, %16 : vector<128x64xf32>
    %18 = arith.truncf %17 : vector<128x64xf32> to vector<128x64xbf16>
    %cst_13 = arith.constant dense<0.000000e+00> : vector<128x64xf32>
    %19 = tpu.matmul %3, %18, %cst_13 {dimension_numbers = #tpu.dot_dimension_numbers<[1], [0], [0], [1], [0, 0, 1, 1], [], []>} : vector<128x128xbf16>, vector<128x64xbf16>, vector<128x64xf32> -> vector<128x64xf32>
    %20 = arith.truncf %19 : vector<128x64xf32> to vector<128x64xbf16>
    %21 = tpu.concatenate %18, %20 in 1 : vector<128x64xbf16>, vector<128x64xbf16> -> vector<128x128xbf16>
    %c0_14 = arith.constant 0 : index
    %c0_15 = arith.constant 0 : index
    %c0_16 = arith.constant 0 : index
    %22 = vector.load %arg6[%c0_14, %c0_15, %c0_16] : memref<3x128x64xbf16, #tpu.memory_space<vmem>>, vector<1x128x64xbf16>
    %23 = vector.shape_cast %22 : vector<1x128x64xbf16> to vector<128x64xbf16>
    %cst_17 = arith.constant dense<0.000000e+00> : vector<128x64xf32>
    %24 = tpu.matmul %21, %23, %cst_17 {dimension_numbers = #tpu.dot_dimension_numbers<[1], [0], [0], [1], [0, 0, 1, 1], [], []>} : vector<128x128xbf16>, vector<128x64xbf16>, vector<128x64xf32> -> vector<128x64xf32>
    %c0_18 = arith.constant 0 : index
    %c0_19 = arith.constant 0 : index
    %c0_20 = arith.constant 0 : index
    %25 = vector.load %arg7[%c0_18, %c0_19, %c0_20] : memref<3x1x64xf32, #tpu.memory_space<vmem>>, vector<1x1x64xf32>
    %26 = vector.shape_cast %25 : vector<1x1x64xf32> to vector<1x64xf32>
    %27 = vector.broadcast %26 : vector<1x64xf32> to vector<128x64xf32>
    %28 = arith.addf %24, %27 : vector<128x64xf32>
    %cst_21 = arith.constant 0.000000e+00 : f32
    %29 = vector.broadcast %cst_21 : f32 to vector<128x64xf32>
    %30 = arith.maximumf %28, %29 : vector<128x64xf32>
    %cst_22 = arith.constant 0.000000e+00 : f32
    %31 = vector.broadcast %cst_22 : f32 to vector<128x64xf32>
    %32 = arith.cmpf ogt, %28, %31 : vector<128x64xf32>
    %cst_23 = arith.constant 0.00999999977 : f32
    %33 = vector.broadcast %cst_23 : f32 to vector<128x64xf32>
    %34 = arith.mulf %33, %28 : vector<128x64xf32>
    %35 = arith.select %32, %28, %34 : vector<128x64xi1>, vector<128x64xf32>
    %36 = vector.shape_cast %6 : vector<1x64xi1> to vector<1x64xi1>
    %37 = vector.broadcast %36 : vector<1x64xi1> to vector<128x64xi1>
    %38 = arith.select %37, %30, %35 : vector<128x64xi1>, vector<128x64xf32>
    %cst_24 = arith.constant dense<0.000000e+00> : vector<64xf32>
    %39 = vector.multi_reduction <add>, %38, %cst_24 [0] : vector<128x64xf32> to vector<64xf32>
    %40 = vector.shape_cast %39 : vector<64xf32> to vector<1x64xf32>
    %cst_25 = arith.constant 7.812500e-03 : f32
    %41 = vector.broadcast %cst_25 : f32 to vector<1x64xf32>
    %42 = arith.mulf %40, %41 : vector<1x64xf32>
    %43 = arith.mulf %38, %38 : vector<128x64xf32>
    %cst_26 = arith.constant dense<0.000000e+00> : vector<64xf32>
    %44 = vector.multi_reduction <add>, %43, %cst_26 [0] : vector<128x64xf32> to vector<64xf32>
    %45 = vector.shape_cast %44 : vector<64xf32> to vector<1x64xf32>
    %cst_27 = arith.constant 7.812500e-03 : f32
    %46 = vector.broadcast %cst_27 : f32 to vector<1x64xf32>
    %47 = arith.mulf %45, %46 : vector<1x64xf32>
    %48 = arith.mulf %42, %42 : vector<1x64xf32>
    %49 = arith.subf %47, %48 : vector<1x64xf32>
    %cst_28 = arith.constant 0.000000e+00 : f32
    %50 = vector.broadcast %cst_28 : f32 to vector<1x64xf32>
    %51 = arith.maximumf %49, %50 : vector<1x64xf32>
    %cst_29 = arith.constant 9.99999974E-6 : f32
    %52 = vector.broadcast %cst_29 : f32 to vector<1x64xf32>
    %53 = arith.addf %51, %52 : vector<1x64xf32>
    %54 = math.rsqrt %53 : vector<1x64xf32>
    %55 = arith.mulf %7, %54 : vector<1x64xf32>
    %56 = arith.mulf %42, %55 : vector<1x64xf32>
    %57 = arith.subf %8, %56 : vector<1x64xf32>
    %58 = vector.broadcast %55 : vector<1x64xf32> to vector<128x64xf32>
    %59 = arith.mulf %38, %58 : vector<128x64xf32>
    %60 = vector.broadcast %57 : vector<1x64xf32> to vector<128x64xf32>
    %61 = arith.addf %59, %60 : vector<128x64xf32>
    %62 = arith.truncf %61 : vector<128x64xf32> to vector<128x64xbf16>
    %cst_30 = arith.constant dense<0.000000e+00> : vector<128x64xf32>
    %63 = tpu.matmul %3, %62, %cst_30 {dimension_numbers = #tpu.dot_dimension_numbers<[1], [0], [0], [1], [0, 0, 1, 1], [], []>} : vector<128x128xbf16>, vector<128x64xbf16>, vector<128x64xf32> -> vector<128x64xf32>
    %64 = arith.truncf %63 : vector<128x64xf32> to vector<128x64xbf16>
    %65 = tpu.concatenate %62, %64 in 1 : vector<128x64xbf16>, vector<128x64xbf16> -> vector<128x128xbf16>
    %c1 = arith.constant 1 : index
    %c0_31 = arith.constant 0 : index
    %c0_32 = arith.constant 0 : index
    %66 = vector.load %arg6[%c1, %c0_31, %c0_32] : memref<3x128x64xbf16, #tpu.memory_space<vmem>>, vector<1x128x64xbf16>
    %67 = vector.shape_cast %66 : vector<1x128x64xbf16> to vector<128x64xbf16>
    %cst_33 = arith.constant dense<0.000000e+00> : vector<128x64xf32>
    %68 = tpu.matmul %65, %67, %cst_33 {dimension_numbers = #tpu.dot_dimension_numbers<[1], [0], [0], [1], [0, 0, 1, 1], [], []>} : vector<128x128xbf16>, vector<128x64xbf16>, vector<128x64xf32> -> vector<128x64xf32>
    %c1_34 = arith.constant 1 : index
    %c0_35 = arith.constant 0 : index
    %c0_36 = arith.constant 0 : index
    %69 = vector.load %arg7[%c1_34, %c0_35, %c0_36] : memref<3x1x64xf32, #tpu.memory_space<vmem>>, vector<1x1x64xf32>
    %70 = vector.shape_cast %69 : vector<1x1x64xf32> to vector<1x64xf32>
    %71 = vector.broadcast %70 : vector<1x64xf32> to vector<128x64xf32>
    %72 = arith.addf %68, %71 : vector<128x64xf32>
    %73 = math.tanh %72 : vector<128x64xf32>
    %cst_37 = arith.constant 0.000000e+00 : f32
    %74 = vector.broadcast %cst_37 : f32 to vector<128x64xf32>
    %75 = arith.maximumf %72, %74 : vector<128x64xf32>
    %76 = vector.shape_cast %6 : vector<1x64xi1> to vector<1x64xi1>
    %77 = vector.broadcast %76 : vector<1x64xi1> to vector<128x64xi1>
    %78 = arith.select %77, %73, %75 : vector<128x64xi1>, vector<128x64xf32>
    %cst_38 = arith.constant dense<0.000000e+00> : vector<64xf32>
    %79 = vector.multi_reduction <add>, %78, %cst_38 [0] : vector<128x64xf32> to vector<64xf32>
    %80 = vector.shape_cast %79 : vector<64xf32> to vector<1x64xf32>
    %cst_39 = arith.constant 7.812500e-03 : f32
    %81 = vector.broadcast %cst_39 : f32 to vector<1x64xf32>
    %82 = arith.mulf %80, %81 : vector<1x64xf32>
    %83 = arith.mulf %78, %78 : vector<128x64xf32>
    %cst_40 = arith.constant dense<0.000000e+00> : vector<64xf32>
    %84 = vector.multi_reduction <add>, %83, %cst_40 [0] : vector<128x64xf32> to vector<64xf32>
    %85 = vector.shape_cast %84 : vector<64xf32> to vector<1x64xf32>
    %cst_41 = arith.constant 7.812500e-03 : f32
    %86 = vector.broadcast %cst_41 : f32 to vector<1x64xf32>
    %87 = arith.mulf %85, %86 : vector<1x64xf32>
    %88 = arith.mulf %82, %82 : vector<1x64xf32>
    %89 = arith.subf %87, %88 : vector<1x64xf32>
    %cst_42 = arith.constant 0.000000e+00 : f32
    %90 = vector.broadcast %cst_42 : f32 to vector<1x64xf32>
    %91 = arith.maximumf %89, %90 : vector<1x64xf32>
    %cst_43 = arith.constant 9.99999974E-6 : f32
    %92 = vector.broadcast %cst_43 : f32 to vector<1x64xf32>
    %93 = arith.addf %91, %92 : vector<1x64xf32>
    %94 = math.rsqrt %93 : vector<1x64xf32>
    %95 = arith.mulf %7, %94 : vector<1x64xf32>
    %96 = arith.mulf %82, %95 : vector<1x64xf32>
    %97 = arith.subf %8, %96 : vector<1x64xf32>
    %98 = vector.broadcast %95 : vector<1x64xf32> to vector<128x64xf32>
    %99 = arith.mulf %78, %98 : vector<128x64xf32>
    %100 = vector.broadcast %97 : vector<1x64xf32> to vector<128x64xf32>
    %101 = arith.addf %99, %100 : vector<128x64xf32>
    %102 = arith.truncf %101 : vector<128x64xf32> to vector<128x64xbf16>
    %cst_44 = arith.constant dense<0.000000e+00> : vector<128x64xf32>
    %103 = tpu.matmul %3, %102, %cst_44 {dimension_numbers = #tpu.dot_dimension_numbers<[1], [0], [0], [1], [0, 0, 1, 1], [], []>} : vector<128x128xbf16>, vector<128x64xbf16>, vector<128x64xf32> -> vector<128x64xf32>
    %104 = arith.truncf %103 : vector<128x64xf32> to vector<128x64xbf16>
    %105 = tpu.concatenate %102, %104 in 1 : vector<128x64xbf16>, vector<128x64xbf16> -> vector<128x128xbf16>
    %c2 = arith.constant 2 : index
    %c0_45 = arith.constant 0 : index
    %c0_46 = arith.constant 0 : index
    %106 = vector.load %arg6[%c2, %c0_45, %c0_46] : memref<3x128x64xbf16, #tpu.memory_space<vmem>>, vector<1x128x64xbf16>
    %107 = vector.shape_cast %106 : vector<1x128x64xbf16> to vector<128x64xbf16>
    %cst_47 = arith.constant dense<0.000000e+00> : vector<128x64xf32>
    %108 = tpu.matmul %105, %107, %cst_47 {dimension_numbers = #tpu.dot_dimension_numbers<[1], [0], [0], [1], [0, 0, 1, 1], [], []>} : vector<128x128xbf16>, vector<128x64xbf16>, vector<128x64xf32> -> vector<128x64xf32>
    %c2_48 = arith.constant 2 : index
    %c0_49 = arith.constant 0 : index
    %c0_50 = arith.constant 0 : index
    %109 = vector.load %arg7[%c2_48, %c0_49, %c0_50] : memref<3x1x64xf32, #tpu.memory_space<vmem>>, vector<1x1x64xf32>
    %110 = vector.shape_cast %109 : vector<1x1x64xf32> to vector<1x64xf32>
    %111 = vector.broadcast %110 : vector<1x64xf32> to vector<128x64xf32>
    %112 = arith.addf %108, %111 : vector<128x64xf32>
    %cst_51 = arith.constant 0.000000e+00 : f32
    %113 = vector.broadcast %cst_51 : f32 to vector<128x64xf32>
    %114 = arith.maximumf %112, %113 : vector<128x64xf32>
    %115 = math.tanh %112 : vector<128x64xf32>
    %116 = vector.shape_cast %6 : vector<1x64xi1> to vector<1x64xi1>
    %117 = vector.broadcast %116 : vector<1x64xi1> to vector<128x64xi1>
    %118 = arith.select %117, %114, %115 : vector<128x64xi1>, vector<128x64xf32>
    %cst_52 = arith.constant dense<0.000000e+00> : vector<64xf32>
    %119 = vector.multi_reduction <add>, %118, %cst_52 [0] : vector<128x64xf32> to vector<64xf32>
    %120 = vector.shape_cast %119 : vector<64xf32> to vector<1x64xf32>
    %cst_53 = arith.constant 7.812500e-03 : f32
    %121 = vector.broadcast %cst_53 : f32 to vector<1x64xf32>
    %122 = arith.mulf %120, %121 : vector<1x64xf32>
    %123 = arith.mulf %118, %118 : vector<128x64xf32>
    %cst_54 = arith.constant dense<0.000000e+00> : vector<64xf32>
    %124 = vector.multi_reduction <add>, %123, %cst_54 [0] : vector<128x64xf32> to vector<64xf32>
    %125 = vector.shape_cast %124 : vector<64xf32> to vector<1x64xf32>
    %cst_55 = arith.constant 7.812500e-03 : f32
    %126 = vector.broadcast %cst_55 : f32 to vector<1x64xf32>
    %127 = arith.mulf %125, %126 : vector<1x64xf32>
    %128 = arith.mulf %122, %122 : vector<1x64xf32>
    %129 = arith.subf %127, %128 : vector<1x64xf32>
    %cst_56 = arith.constant 0.000000e+00 : f32
    %130 = vector.broadcast %cst_56 : f32 to vector<1x64xf32>
    %131 = arith.maximumf %129, %130 : vector<1x64xf32>
    %cst_57 = arith.constant 9.99999974E-6 : f32
    %132 = vector.broadcast %cst_57 : f32 to vector<1x64xf32>
    %133 = arith.addf %131, %132 : vector<1x64xf32>
    %134 = math.rsqrt %133 : vector<1x64xf32>
    %135 = arith.mulf %7, %134 : vector<1x64xf32>
    %136 = arith.mulf %122, %135 : vector<1x64xf32>
    %137 = arith.subf %8, %136 : vector<1x64xf32>
    %138 = vector.broadcast %135 : vector<1x64xf32> to vector<128x64xf32>
    %139 = arith.mulf %118, %138 : vector<128x64xf32>
    %140 = vector.broadcast %137 : vector<1x64xf32> to vector<128x64xf32>
    %141 = arith.addf %139, %140 : vector<128x64xf32>
    %142 = arith.truncf %141 : vector<128x64xf32> to vector<128x64xbf16>
    %c0_58 = arith.constant 0 : index
    %c0_59 = arith.constant 0 : index
    %c0_60 = arith.constant 0 : index
    %143 = vector.load %arg3[%c0_58, %c0_59, %c0_60] : memref<1x16x128xbf16, #tpu.memory_space<vmem>>, vector<1x16x128xbf16>
    %144 = vector.shape_cast %143 : vector<1x16x128xbf16> to vector<16x128xbf16>
    %cst_61 = arith.constant dense<0.000000e+00> : vector<16x64xf32>
    %145 = tpu.matmul %144, %142, %cst_61 {dimension_numbers = #tpu.dot_dimension_numbers<[1], [0], [0], [1], [0, 0, 1, 1], [], []>} : vector<16x128xbf16>, vector<128x64xbf16>, vector<16x64xf32> -> vector<16x64xf32>
    %146 = vector.extract_strided_slice %145 {offsets = [0, 0], sizes = [8, 64], strides = [1, 1]} : vector<16x64xf32> to vector<8x64xf32>
    %147 = vector.extract_strided_slice %145 {offsets = [8, 0], sizes = [8, 64], strides = [1, 1]} : vector<16x64xf32> to vector<8x64xf32>
    %148 = vector.shape_cast %6 : vector<1x64xi1> to vector<1x64xi1>
    %149 = vector.broadcast %148 : vector<1x64xi1> to vector<8x64xi1>
    %150 = arith.select %149, %146, %147 : vector<8x64xi1>, vector<8x64xf32>
    %151 = arith.truncf %150 : vector<8x64xf32> to vector<8x64xbf16>
    %c0_62 = arith.constant 0 : index
    %c0_63 = arith.constant 0 : index
    %152 = vector.load %arg10[%c0_62, %c0_63] : memref<64x64xbf16, #tpu.memory_space<vmem>>, vector<64x64xbf16>
    %cst_64 = arith.constant dense<0.000000e+00> : vector<8x64xf32>
    %153 = tpu.matmul %151, %152, %cst_64 {dimension_numbers = #tpu.dot_dimension_numbers<[1], [0], [0], [1], [0, 0, 1, 1], [], []>} : vector<8x64xbf16>, vector<64x64xbf16>, vector<8x64xf32> -> vector<8x64xf32>
    %c0_65 = arith.constant 0 : index
    %c0_66 = arith.constant 0 : index
    %154 = vector.load %arg11[%c0_65, %c0_66] : memref<1x64xf32, #tpu.memory_space<vmem>>, vector<1x64xf32>
    %155 = vector.broadcast %154 : vector<1x64xf32> to vector<8x64xf32>
    %156 = arith.addf %153, %155 : vector<8x64xf32>
    %cst_67 = arith.constant 0.000000e+00 : f32
    %157 = vector.broadcast %cst_67 : f32 to vector<8x64xf32>
    %158 = arith.maximumf %156, %157 : vector<8x64xf32>
    %c0_68 = arith.constant 0 : index
    %c0_69 = arith.constant 0 : index
    %159 = vector.load %arg12[%c0_68, %c0_69] : memref<1x64xf32, #tpu.memory_space<vmem>>, vector<1x64xf32>
    %160 = vector.broadcast %159 : vector<1x64xf32> to vector<8x64xf32>
    %161 = arith.mulf %158, %160 : vector<8x64xf32>
    %cst_70 = arith.constant dense<0.000000e+00> : vector<8xf32>
    %162 = vector.multi_reduction <add>, %161, %cst_70 [1] : vector<8x64xf32> to vector<8xf32>
    %163 = vector.shape_cast %162 : vector<8xf32> to vector<8x1xf32>
    %c0_71 = arith.constant 0 : index
    %c0_72 = arith.constant 0 : index
    %164 = vector.load %arg13[%c0_71, %c0_72] : memref<1x1xf32, #tpu.memory_space<vmem>>, vector<1x1xf32>
    %165 = vector.broadcast %164 : vector<1x1xf32> to vector<8x1xf32>
    %166 = arith.addf %163, %165 : vector<8x1xf32>
    %167 = vector.shape_cast %166 : vector<8x1xf32> to vector<8x1xf32>
    %168 = vector.broadcast %167 : vector<8x1xf32> to vector<8x128xf32>
    %c0_73 = arith.constant 0 : index
    %c0_74 = arith.constant 0 : index
    %c0_75 = arith.constant 0 : index
    %169 = vector.load %arg14[%c0_73, %c0_74, %c0_75] : memref<1x8x128xf32, #tpu.memory_space<vmem>>, vector<1x8x128xf32>
    %170 = vector.shape_cast %169 : vector<1x8x128xf32> to vector<8x128xf32>
    %171 = vector.shape_cast %168 : vector<8x128xf32> to vector<1x8x128xf32>
    tpu.vector_store %arg14[%c0_73, %c0_74, %c0_75], %171 {strides = array<i32>} : memref<1x8x128xf32, #tpu.memory_space<vmem>>, vector<1x8x128xf32>,
    return
  }
  func.func @transform_0(%arg0: i32) -> (i32, i32, i32) {
    %c0_i32 = arith.constant 0 : i32
    %c0_i32_0 = arith.constant 0 : i32
    %c0_i32_1 = arith.constant 0 : i32
    return %arg0, %c0_i32, %c0_i32_0 : i32, i32, i32
  }
  func.func @transform_1(%arg0: i32) -> (i32, i32, i32) {
    %c0_i32 = arith.constant 0 : i32
    %c0_i32_0 = arith.constant 0 : i32
    %c0_i32_1 = arith.constant 0 : i32
    return %arg0, %c0_i32, %c0_i32_0 : i32, i32, i32
  }
  func.func @transform_2(%arg0: i32) -> (i32, i32, i32) {
    %c0_i32 = arith.constant 0 : i32
    %c0_i32_0 = arith.constant 0 : i32
    %c0_i32_1 = arith.constant 0 : i32
    return %arg0, %c0_i32, %c0_i32_0 : i32, i32, i32
  }
  func.func @transform_3(%arg0: i32) -> (i32, i32) {
    %c0_i32 = arith.constant 0 : i32
    %c0_i32_0 = arith.constant 0 : i32
    %c0_i32_1 = arith.constant 0 : i32
    return %c0_i32, %c0_i32_0 : i32, i32
  }
  func.func @transform_4(%arg0: i32) -> (i32, i32) {
    %c0_i32 = arith.constant 0 : i32
    %c0_i32_0 = arith.constant 0 : i32
    %c0_i32_1 = arith.constant 0 : i32
    return %c0_i32, %c0_i32_0 : i32, i32
  }
  func.func @transform_5(%arg0: i32) -> (i32, i32, i32) {
    %c0_i32 = arith.constant 0 : i32
    %c0_i32_0 = arith.constant 0 : i32
    %c0_i32_1 = arith.constant 0 : i32
    %c0_i32_2 = arith.constant 0 : i32
    return %c0_i32, %c0_i32_0, %c0_i32_1 : i32, i32, i32
  }
  func.func @transform_6(%arg0: i32) -> (i32, i32, i32) {
    %c0_i32 = arith.constant 0 : i32
    %c0_i32_0 = arith.constant 0 : i32
    %c0_i32_1 = arith.constant 0 : i32
    %c0_i32_2 = arith.constant 0 : i32
    return %c0_i32, %c0_i32_0, %c0_i32_1 : i32, i32, i32
  }
  func.func @transform_7(%arg0: i32) -> (i32, i32) {
    %c0_i32 = arith.constant 0 : i32
    %c0_i32_0 = arith.constant 0 : i32
    %c0_i32_1 = arith.constant 0 : i32
    return %c0_i32, %c0_i32_0 : i32, i32
  }
  func.func @transform_8(%arg0: i32) -> (i32, i32) {
    %c0_i32 = arith.constant 0 : i32
    %c0_i32_0 = arith.constant 0 : i32
    %c0_i32_1 = arith.constant 0 : i32
    return %c0_i32, %c0_i32_0 : i32, i32
  }
  func.func @transform_9(%arg0: i32) -> (i32, i32) {
    %c0_i32 = arith.constant 0 : i32
    %c0_i32_0 = arith.constant 0 : i32
    %c0_i32_1 = arith.constant 0 : i32
    return %c0_i32, %c0_i32_0 : i32, i32
  }
  func.func @transform_10(%arg0: i32) -> (i32, i32) {
    %c0_i32 = arith.constant 0 : i32
    %c0_i32_0 = arith.constant 0 : i32
    %c0_i32_1 = arith.constant 0 : i32
    return %c0_i32, %c0_i32_0 : i32, i32
  }
  func.func @transform_11(%arg0: i32) -> (i32, i32) {
    %c0_i32 = arith.constant 0 : i32
    %c0_i32_0 = arith.constant 0 : i32
    %c0_i32_1 = arith.constant 0 : i32
    return %c0_i32, %c0_i32_0 : i32, i32
  }
  func.func @transform_12(%arg0: i32) -> (i32, i32) {
    %c0_i32 = arith.constant 0 : i32
    %c0_i32_0 = arith.constant 0 : i32
    %c0_i32_1 = arith.constant 0 : i32
    return %c0_i32, %c0_i32_0 : i32, i32
  }
  func.func @transform_13(%arg0: i32) -> (i32, i32, i32) {
    %c0_i32 = arith.constant 0 : i32
    %c0_i32_0 = arith.constant 0 : i32
    %c0_i32_1 = arith.constant 0 : i32
    return %arg0, %c0_i32, %c0_i32_0 : i32, i32, i32
  }
}

</mosaic_0001>

<bundles_post_ra>
// kernel: squeeze.1
= control target key start
LH: loop header
LB: loop body
LE: loop exit
PB: predicated region body
PF: predicated region fallthrough
CT: control target
= control target key end

     0   :  { %s85_s0 = inlined_call_operand.vmem [shape: f32[2,8], index: 0, kind: input, shape index: {}]   ;;  %s86_s1 = inlined_call_operand.hbm [shape: f32[16], index: 1, kind: output, shape index: {}]  }
   0x1   :  { %v5_v0 = vld [vmem:[%s85_s0] sm:$0x3] }
   0x2   :  { %6 = vst [vmem:[#allocation3] sm:$0x3] %v5_v0 }
   0x3   :  { %2 = vsyncpa [#allocation1], 0  ;;  %vm8_vm0 = vcmask 64512   ;;  %s58_s0 = smov 8   ;;  %vm14_vm1 = vcmask 130112   ;;  %s59_s8 = smov [#allocation0]  }
   0x4   :  { %s26_s9 = sshll.u32 %s59_s8, 4  ;;  %s27_s9 = int_to_ptr.vmem [resolvable:$true] %s26_s9 }
   0x5   :  { %s34_s10 = scalar_lea.vmem %s27_s9, 16  ;;  %s38_s11 = scalar_lea.vmem %s27_s9, 32 }
   0x6   :  { %p35_p0 = scmp.ne.s32.totalorder %s27_s9, %s34_s10  ;;  %p39_p1 = scmp.lt.s32.totalorder %s27_s9, %s27_s9 }
   0x7   :  { %p40_p2 = scmp.lt.s32.totalorder %s38_s11, %s34_s10 }
   0x9   :  { %v11_v1 = vld [vmem:[#allocation3 + $0x1] sm:$0x1]   ;;  %v7_v2 = vld [vmem:[#allocation3] sm:$0x1]   ;;  %p41_p3 = por %p40_p2, %p39_p1 }
   0xa   :  { %12 = vrot.lane.b32.xlu0 %v11_v1, %s58_s0  ;;  %9 = vst.msk [vmem:[#allocation2] sm:$0x1] %vm8_vm0, %v7_v2  }
   0xb   :  { %p42_p4 = pnand %p41_p3, %p35_p0 }
  0x7c   :  { %v13_v3 = vpop.permute.xlu0 %12  }
  0x7d   :  { %15 = vst.msk [vmem:[#allocation2] sm:$0x1] %vm14_vm1, %v13_v3  }
  0x84   :  { %v19_v4 = vld [vmem:[#allocation2] sm:$0x1] }
  0x85   :  { %21 = vst [vmem:[#allocation0] sm:$0x1] %v19_v4 }
  0x86   :  { %45 = shalt.err (!%p42_p4)
}
  0x87   :  { %s46_s14 = scalar_lea.hbm %s86_s1, 16 }
  0x88   :  { %p47_p5 = scmp.ne.s32.totalorder %s86_s1, %s46_s14  ;;  %p50_p6 = scmp.lt.u32.totalorder %s46_s14, %s86_s1 }
  0x8a   :  { %p52_p7 = pnand %p50_p6, %p47_p5 }
  0x8c   :  { %55 = shalt.err (!%p52_p7)
}
  0x8d   :  { %29 = dma.vmem_to_hbm [thread:$0]  %s27_s9, 16, %s86_s1, [#allocation1]  }
  0x8e   :  { %56 = dma.done.wait [#allocation1], 16  }
  0x8f   :  { %57 = vsyncadd [#allocation1], 4294967280 }
  0x90   :  { %31 = vsyncpa [#allocation1], 1 }

// kernel: nas_gnn_forward.1
= control target key start
LH: loop header
LB: loop body
LE: loop exit
PB: predicated region body
PF: predicated region fallthrough
CT: control target
= control target key end

     0   :  { %s3225_s27 = smov 0   ;;  %s4243_s0 = inlined_call_operand.vmem [shape: f32[2,128,1], index: 0, kind: input, shape index: {}]   ;;  %s4244_s1 = inlined_call_operand.vmem [shape: bf16[2,128,128], index: 1, kind: input, shape index: {}]   ;;  %s4245_s2 = inlined_call_operand.vmem [shape: bf16[2,16,128], index: 2, kind: input, shape index: {}]   ;;  %s4246_s3 = inlined_call_operand.vmem [shape: f32[1,64], index: 3, kind: input, shape index: {}]   ;;  %s4247_s4 = inlined_call_operand.vmem [shape: f32[1,64], index: 4, kind: input, shape index: {}]   ;;  %s4248_s5 = inlined_call_operand.vmem [shape: bf16[3,128,64], index: 5, kind: input, shape index: {}]   ;;  %s4249_s6 = inlined_call_operand.vmem [shape: f32[3,1,64], index: 6, kind: input, shape index: {}]   ;;  %s4250_s7 = inlined_call_operand.vmem [shape: f32[1,64], index: 7, kind: input, shape index: {}]   ;;  %s4251_s8 = inlined_call_operand.vmem [shape: f32[1,64], index: 8, kind: input, shape index: {}]   ;;  %s4252_s9 = inlined_call_operand.vmem [shape: bf16[64,64], index: 9, kind: input, shape index: {}]   ;;  %s4253_s10 = inlined_call_operand.vmem [shape: f32[1,64], index: 10, kind: input, shape index: {}]   ;;  %s4254_s11 = inlined_call_operand.vmem [shape: f32[1,64], index: 11, kind: input, shape index: {}]   ;;  %s4255_s12 = inlined_call_operand.<no memory space> [shape: f32[1,1], index: 12, kind: input, shape index: {}]   ;;  %s4256_s13 = inlined_call_operand.vmem [shape: f32[2,8,128], index: 13, kind: output, shape index: {}]  }
   0x1   :  { %v18_v0 = vstv %s4255_s12 }
   0x2   :  { %19 = vst [vmem:[#allocation2] sm:$0x1] %v18_v0 }
   0x3 LB: > { %s2579_s28 = sadd.s32 4294967295, %s3146_s27   ;;  %p2583_p0 = scmp.ge.s32.totalorder %s3146_s27, 1  ;;  %s3146_s27 = sphi %s3225_s27, %s25_s27  }
   0x4   : > { %p409_p1 = scmp.lt.s32.totalorder %s3146_s27, 3 }
   0x6   : > { %p410_p2 = pnand %p2583_p0, %p409_p1 }
   0x7   : > { %p462_p3 = scmp.lt.s32.totalorder (!%p410_p2), %s2579_s28, 1  ;;  %v3148_v1 = vmov (!%p410_p2), 0   ;;  %v3252_v19 = vld [vmem:[%s4246_s3] ss:$0 sm:$0xff] (!%p410_p2)  ;;  %s3149_s24 = smov (!%p410_p2), 64   ;;  %vm846_vm0 = vcmask (!%p410_p2), 523264  }
   0x8   : > { %413 = sbr.rel (%p410_p2) target bundleno = 2920 (0xb68), region = 72  ;;  %3023 = vset.pattern.permute.xlu1 (!%p410_p2), %v3148_v1  ;;  %3022 = vset.pattern.permute.xlu0 (!%p410_p2), %v3148_v1  ;;  %v3257_v22 = vld [vmem:[%s4247_s4] ss:$0 sm:$0xff] (!%p410_p2) }
   0xf   : > { %s4258_s28 = smov (!%p462_p3, %s2579_s28), 1 }
  0x10   : > { %s2673_s12 = sshll.u32 %s4258_s28, 7  ;;  %s2674_s15 = sshll.u32 %s4258_s28, 6 }
  0x11   : > { %s466_s14 = scalar_lea.vmem %s4243_s0, %s2673_s12  ;;  %s3243_s18 = scalar_lea.vmem %s4244_s1, %s2674_s15 }
  0x12   : > { %v484_v2 = vld [vmem:[%s466_s14 + $0x10] sm:$0xff]  ;;  %v482_v3 = vld [vmem:[%s466_s14] sm:$0xff]  ;;  %v485_v4 = vld [vmem:[%s466_s14 + $0x18] sm:$0xff]  ;;  %s2675_s22 = sshll.u32 %s4258_s28, 3 }
  0x13   : > { %532 = vperm.xlu1 %3023, %v484_v2   ;;  %522 = vperm.xlu0 %3022, %v482_v3   ;;  %v483_v5 = vld [vmem:[%s466_s14 + $0x8] sm:$0xff]  ;;  %v486_v7 = vld [vmem:[%s466_s14 + $0x20] sm:$0xff]  ;;  %v489_v8 = vld [vmem:[%s466_s14 + $0x38] sm:$0xff]  ;;  %s3998_s26 = scalar_lea.vmem %s4245_s2, %s2675_s22  ;;  %s480_s30 = scalar_lea.vmem %s4256_s13, %s2675_s22 }
  0x14   : > { %v487_v6 = vld [vmem:[%s466_s14 + $0x28] sm:$0xff]  ;;  %v488_v9 = vld [vmem:[%s466_s14 + $0x30] sm:$0xff]  ;;  %v490_v11 = vld [vmem:[%s466_s14 + $0x40] sm:$0xff] }
  0x15   : > { %v491_v10 = vld [vmem:[%s466_s14 + $0x48] sm:$0xff]  ;;  %v493_v12 = vld [vmem:[%s466_s14 + $0x58] sm:$0xff]  ;;  %v492_v13 = vld [vmem:[%s466_s14 + $0x50] sm:$0xff] }
  0x16   : > { %v495_v14 = vld [vmem:[%s466_s14 + $0x68] sm:$0xff]  ;;  %v494_v15 = vld [vmem:[%s466_s14 + $0x60] sm:$0xff]  ;;  %v497_v16 = vld [vmem:[%s466_s14 + $0x78] sm:$0xff] }
  0x17   : > { %537 = vperm.xlu1 %3023, %v485_v4   ;;  %527 = vperm.xlu0 %3022, %v483_v5   ;;  %v496_v17 = vld [vmem:[%s466_s14 + $0x70] sm:$0xff]  ;;  %v3246_v18 = vld [vmem:[%s3243_s18] sm:$0xff]  }
  0x18   : > { %2802 = vmatprep.mubr.bf16.mxu0 %v3246_v18 }
  0x1b   : > { %547 = vperm.xlu1 %3023, %v487_v6   ;;  %542 = vperm.xlu0 %3022, %v486_v7  }
  0x1f   : > { %557 = vperm.xlu1 %3023, %v489_v8   ;;  %552 = vperm.xlu0 %3022, %v488_v9  }
  0x23   : > { %567 = vperm.xlu1 %3023, %v491_v10   ;;  %562 = vperm.xlu0 %3022, %v490_v11  }
  0x27   : > { %577 = vperm.xlu1 %3023, %v493_v12   ;;  %572 = vperm.xlu0 %3022, %v492_v13  }
  0x2b   : > { %587 = vperm.xlu1 %3023, %v495_v14   ;;  %582 = vperm.xlu0 %3022, %v494_v15  }
  0x2f   : > { %597 = vperm.xlu1 %3023, %v497_v16   ;;  %592 = vperm.xlu0 %3022, %v496_v17  }
  0x92   : > { %v533_v20 = vpop.permute.xlu1 %532  ;;  %v523_v21 = vpop.permute.xlu0 %522 }
  0x93   : > { %v608_v23 = vmul.f32 %v3252_v19, %v533_v20  ;;  %v606_v24 = vmul.f32 %v3252_v19, %v523_v21 }
  0x95   : > { %v631_v25 = vadd.f32 %v3257_v22, %v608_v23  ;;  %v629_v26 = vadd.f32 %v3257_v22, %v606_v24 }
  0x96   : > { %v538_v27 = vpop.permute.xlu1 %537  ;;  %v528_v28 = vpop.permute.xlu0 %527 }
  0x97   : > { %v609_v29 = vmul.f32 %v3252_v19, %v538_v27  ;;  %v607_v30 = vmul.f32 %v3252_v19, %v528_v28  ;;  %v647_v33 = vmax.f32 %v631_v25, 0.0  ;;  %v645_v34 = vmax.f32 %v629_v26, 0.0 }
  0x99   : > { %v632_v31 = vadd.f32 %v3257_v22, %v609_v29  ;;  %v630_v32 = vadd.f32 %v3257_v22, %v607_v30 }
  0x9a   : > { %v548_v35 = vpop.permute.xlu1 %547  ;;  %v543_v36 = vpop.permute.xlu0 %542 }
  0x9b   : > { %v648_v37 = vmax.f32 %v632_v31, 0.0  ;;  %v646_v38 = vmax.f32 %v630_v32, 0.0  ;;  %v611_v39 = vmul.f32 %v3252_v19, %v548_v35  ;;  %v610_v40 = vmul.f32 %v3252_v19, %v543_v36  ;;  %v3327_v31 = vld [vmem:[%s3243_s18 + $0x10] sm:$0xff]   ;;  %v3332_v32 = vld [vmem:[%s3243_s18 + $0x18] sm:$0xff]  }
  0x9c   : > { %v3343_v35 = vld [vmem:[%s3243_s18 + $0x30] sm:$0xff]   ;;  %v3348_v36 = vld [vmem:[%s3243_s18 + $0x38] sm:$0xff]  }
  0x9d   : > { %v634_v41 = vadd.f32 %v3257_v22, %v611_v39  ;;  %v633_v42 = vadd.f32 %v3257_v22, %v610_v40  ;;  %v3271_v43 = vpack.c.bf16 %v646_v38, %v645_v34  ;;  %v3273_v46 = vpack.c.bf16 %v648_v37, %v647_v33  ;;  %v3335_v33 = vld [vmem:[%s3243_s18 + $0x20] sm:$0xff]   ;;  %v3340_v34 = vld [vmem:[%s3243_s18 + $0x28] sm:$0xff]   ;;  %v3034_v39 = vld [vmem:[%s4248_s5 + $0x10] sm:$0xff]  }
  0x9e   : > { %v558_v44 = vpop.permute.xlu1 %557  ;;  %v553_v45 = vpop.permute.xlu0 %552  ;;  %v3032_v37 = vld [vmem:[%s4248_s5] sm:$0xff]   ;;  %v3033_v38 = vld [vmem:[%s4248_s5 + $0x8] sm:$0xff]   ;;  %v3035_v40 = vld [vmem:[%s4248_s5 + $0x18] sm:$0xff]  }
  0x9f   : > { %v650_v47 = vmax.f32 %v634_v41, 0.0  ;;  %v649_v48 = vmax.f32 %v633_v42, 0.0  ;;  %v613_v49 = vmul.f32 %v3252_v19, %v558_v44  ;;  %v612_v50 = vmul.f32 %v3252_v19, %v553_v45  ;;  %2786 = vmatprep.subr.bf16.mxu0 %v3271_v43  ;;  %2818 = vmatprep.subr.bf16.mxu1 %v3032_v37  ;;  %v3036_v41 = vld [vmem:[%s4248_s5 + $0x20] sm:$0xff]   ;;  %v3037_v42 = vld [vmem:[%s4248_s5 + $0x28] sm:$0xff]   ;;  %v3038_v44 = vld [vmem:[%s4248_s5 + $0x30] sm:$0xff]  }
  0xa0   : > { %2787 = vmatpush3.bf16.msra.mxu0 %v3271_v43  ;;  %2819 = vmatpush3.bf16.msra.mxu1 %v3032_v37  ;;  %v3039_v45 = vld [vmem:[%s4248_s5 + $0x38] sm:$0xff]  }
  0xa1   : > { %v636_v51 = vadd.f32 %v3257_v22, %v613_v49  ;;  %v635_v52 = vadd.f32 %v3257_v22, %v612_v50  ;;  %2788 = vmatprep.subr.bf16.mxu0 %v3273_v46  ;;  %v3282_v55 = vpack.c.bf16 %v650_v47, %v649_v48  ;;  %2820 = vmatprep.subr.bf16.mxu1 %v3033_v38 }
  0xa2   : > { %v568_v53 = vpop.permute.xlu1 %567  ;;  %v563_v54 = vpop.permute.xlu0 %562 }
  0xa3   : > { %v652_v56 = vmax.f32 %v636_v51, 0.0  ;;  %v651_v57 = vmax.f32 %v635_v52, 0.0  ;;  %v615_v58 = vmul.f32 %v3252_v19, %v568_v53  ;;  %v614_v59 = vmul.f32 %v3252_v19, %v563_v54 }
  0xa4   : > { %2789 = vmatpush3.bf16.msra.mxu0 %v3273_v46  ;;  %2821 = vmatpush3.bf16.msra.mxu1 %v3033_v38 }
  0xa5   : > { %v638_v60 = vadd.f32 %v3257_v22, %v615_v58  ;;  %v637_v61 = vadd.f32 %v3257_v22, %v614_v59  ;;  %2790 = vmatprep.subr.bf16.mxu0 %v3282_v55  ;;  %v3290_v0 = vpack.c.bf16 %v652_v56, %v651_v57  ;;  %2822 = vmatprep.subr.bf16.mxu1 %v3034_v39 }
  0xa6   : > { %v578_v62 = vpop.permute.xlu1 %577  ;;  %v573_v63 = vpop.permute.xlu0 %572 }
  0xa7   : > { %v654_v1 = vmax.f32 %v638_v60, 0.0  ;;  %v653_v2 = vmax.f32 %v637_v61, 0.0  ;;  %v617_v3 = vmul.f32 %v3252_v19, %v578_v62  ;;  %v616_v4 = vmul.f32 %v3252_v19, %v573_v63 }
  0xa8   : > { %2791 = vmatpush3.bf16.msra.mxu0 %v3282_v55  ;;  %2823 = vmatpush3.bf16.msra.mxu1 %v3034_v39  ;;  %v514_v39 = vlaneseq }
  0xa9   : > { %v640_v5 = vadd.f32 %v3257_v22, %v617_v3  ;;  %v639_v6 = vadd.f32 %v3257_v22, %v616_v4  ;;  %2792 = vmatprep.subr.bf16.mxu0 %v3290_v0  ;;  %v3298_v9 = vpack.c.bf16 %v654_v1, %v653_v2  ;;  %2824 = vmatprep.subr.bf16.mxu1 %v3035_v40 }
  0xaa   : > { %v588_v7 = vpop.permute.xlu1 %587  ;;  %v583_v8 = vpop.permute.xlu0 %582 }
  0xab   : > { %v656_v10 = vmax.f32 %v640_v5, 0.0  ;;  %v655_v11 = vmax.f32 %v639_v6, 0.0  ;;  %v619_v12 = vmul.f32 %v3252_v19, %v588_v7  ;;  %v618_v13 = vmul.f32 %v3252_v19, %v583_v8 }
  0xac   : > { %2793 = vmatpush3.bf16.msra.mxu0 %v3290_v0  ;;  %2825 = vmatpush3.bf16.msra.mxu1 %v3035_v40 }
  0xad   : > { %v642_v14 = vadd.f32 %v3257_v22, %v619_v12  ;;  %v641_v15 = vadd.f32 %v3257_v22, %v618_v13  ;;  %2794 = vmatprep.subr.bf16.mxu0 %v3298_v9  ;;  %v3306_v20 = vpack.c.bf16 %v656_v10, %v655_v11  ;;  %2826 = vmatprep.subr.bf16.mxu1 %v3036_v41 }
  0xae   : > { %v598_v16 = vpop.permute.xlu1 %597  ;;  %v593_v17 = vpop.permute.xlu0 %592 }
  0xaf   : > { %v658_v21 = vmax.f32 %v642_v14, 0.0  ;;  %v657_v23 = vmax.f32 %v641_v15, 0.0  ;;  %v621_v24 = vmul.f32 %v3252_v19, %v598_v16  ;;  %v620_v25 = vmul.f32 %v3252_v19, %v593_v17 }
  0xb0   : > { %2795 = vmatpush3.bf16.msra.mxu0 %v3298_v9  ;;  %2827 = vmatpush3.bf16.msra.mxu1 %v3036_v41 }
  0xb1   : > { %v644_v26 = vadd.f32 %v3257_v22, %v621_v24  ;;  %v643_v27 = vadd.f32 %v3257_v22, %v620_v25  ;;  %2796 = vmatprep.subr.bf16.mxu0 %v3306_v20  ;;  %v3314_v30 = vpack.c.bf16 %v658_v21, %v657_v23  ;;  %v3323_v22 = vld [vmem:[%s3243_s18 + $0x8] sm:$0xff]   ;;  %2828 = vmatprep.subr.bf16.mxu1 %v3037_v42 }
  0xb3   : > { %v660_v28 = vmax.f32 %v644_v26, 0.0  ;;  %v659_v29 = vmax.f32 %v643_v27, 0.0 }
  0xb4   : > { %2797 = vmatpush3.bf16.msra.mxu0 %v3306_v20  ;;  %2829 = vmatpush3.bf16.msra.mxu1 %v3037_v42  ;;  %v3409_v42 = vand.u32 127, %v514_v39 }
  0xb5   : > { %2798 = vmatprep.subr.bf16.mxu0 %v3314_v30  ;;  %v3318_v19 = vpack.c.bf16 %v660_v28, %v659_v29  ;;  %2830 = vmatprep.subr.bf16.mxu1 %v3038_v44 }
  0xb6   : > { %vm516_vm3 = vcmp.lt.s32.totalorder %v3409_v42, 32 }
  0xb8   : > { %2799 = vmatpush3.bf16.msra.mxu0 %v3314_v30  ;;  %2831 = vmatpush3.bf16.msra.mxu1 %v3038_v44 }
  0xb9   : > { %2800 = vmatprep.subr.bf16.mxu0 %v3318_v19  ;;  %2832 = vmatprep.subr.bf16.mxu1 %v3039_v45 }
  0xbc   : > { %2801 = vmatpush3.bf16.msra.mxu0 %v3318_v19  ;;  %2833 = vmatpush3.bf16.msra.mxu1 %v3039_v45 }
  0xbf   : > { %2803 = vmatmul.mubr.bf16.vlgmr.msra.gmra.mrb[0].mxu0 %v3323_v22 }
  0xc0   : > { %2806 = vmatprep.mubr.bf16.mxu0 %v3327_v31 }
  0xc7   : > { %2807 = vmatmul.mubr.bf16.gmra.mrb[4].mxu0 %v3332_v32 }
  0xc8   : > { %2810 = vmatprep.mubr.bf16.mxu0 %v3335_v33 }
  0xcf   : > { %2811 = vmatmul.mubr.bf16.gmra.mrb[8].mxu0 %v3340_v34 }
  0xd0   : > { %2814 = vmatprep.mubr.bf16.mxu0 %v3343_v35 }
  0xd7   : > { %2815 = vmatmul.mubr.bf16.gmra.mrb[12].mxu0 %v3348_v36 }
  0xd8   : > { %2866 = vmatprep.mubr.bf16.mxu0 %v3246_v18 }
 0x192   : > { %v2804_v47 = vpop.f32.mrb[0].mxu0 }
 0x193   : > { %v751_v48 = vpop.f32.mrb[1].mxu0 }
 0x194   : > { %v2805_v49 = vpop.f32.mrb[2].mxu0 }
 0x195   : > { %v815_v50 = vpack.c.bf16 %v2805_v49, %v2804_v47  ;;  %v754_v51 = vpop.f32.mrb[3].mxu0 }
 0x196   : > { %v814_v52 = vpack.c.bf16 %v754_v51, %v751_v48 }
 0x197   : > { %832 = vrot.lane.b32.xlu1 %v815_v50, %s3149_s24 }
 0x198   : > { %830 = vrot.lane.b32.xlu0 %v814_v52, %s3149_s24 }
 0x19a   : > { %v2808_v53 = vpop.f32.mrb[4].mxu0 }
 0x19b   : > { %v767_v54 = vpop.f32.mrb[5].mxu0 }
 0x19c   : > { %v2809_v56 = vpop.f32.mrb[6].mxu0 }
 0x19d   : > { %v817_v57 = vpack.c.bf16 %v2809_v56, %v2808_v53  ;;  %v770_v58 = vpop.f32.mrb[7].mxu0 }
 0x19e   : > { %v816_v59 = vpack.c.bf16 %v770_v58, %v767_v54 }
 0x19f   : > { %836 = vrot.lane.b32.xlu1 %v817_v57, %s3149_s24 }
 0x1a0   : > { %834 = vrot.lane.b32.xlu0 %v816_v59, %s3149_s24 }
 0x1a2   : > { %v2812_v60 = vpop.f32.mrb[8].mxu0 }
 0x1a3   : > { %v783_v61 = vpop.f32.mrb[9].mxu0 }
 0x1a4   : > { %v2813_v62 = vpop.f32.mrb[10].mxu0 }
 0x1a5   : > { %v819_v63 = vpack.c.bf16 %v2813_v62, %v2812_v60  ;;  %v786_v1 = vpop.f32.mrb[11].mxu0 }
 0x1a6   : > { %v818_v2 = vpack.c.bf16 %v786_v1, %v783_v61 }
 0x1a7   : > { %840 = vrot.lane.b32.xlu1 %v819_v63, %s3149_s24 }
 0x1a8   : > { %838 = vrot.lane.b32.xlu0 %v818_v2, %s3149_s24 }
 0x1aa   : > { %v2816_v3 = vpop.f32.mrb[12].mxu0 }
 0x1ab   : > { %v799_v4 = vpop.f32.mrb[13].mxu0 }
 0x1ac   : > { %v2817_v5 = vpop.f32.mrb[14].mxu0 }
 0x1ad   : > { %v821_v6 = vpack.c.bf16 %v2817_v5, %v2816_v3  ;;  %v802_v7 = vpop.f32.mrb[15].mxu0 }
 0x1ae   : > { %v820_v8 = vpack.c.bf16 %v802_v7, %v799_v4 }
 0x1af   : > { %844 = vrot.lane.b32.xlu1 %v821_v6, %s3149_s24 }
 0x1b0   : > { %842 = vrot.lane.b32.xlu0 %v820_v8, %s3149_s24 }
 0x209   : > { %v833_v10 = vpop.permute.xlu1 %832 }
 0x20a   : > { %v831_v11 = vpop.permute.xlu0 %830  ;;  %v853_v13 = vsel %vm846_vm0, %v3273_v46, %v833_v10 }
 0x20b   : > { %v849_v12 = vsel %vm846_vm0, %v3271_v43, %v831_v11 }
 0x20c   : > { %2834 = vmatprep.mubr.bf16.mxu1 %v849_v12 }
 0x20d   : > { %2835 = vmatmul.mubr.bf16.vlgmr.msra.gmra.mrb[0].mxu1 %v853_v13 }
 0x211   : > { %v837_v14 = vpop.permute.xlu1 %836 }
 0x212   : > { %v835_v15 = vpop.permute.xlu0 %834  ;;  %v861_v17 = vsel %vm846_vm0, %v3290_v0, %v837_v14 }
 0x213   : > { %v857_v16 = vsel %vm846_vm0, %v3282_v55, %v835_v15 }
 0x214   : > { %2838 = vmatprep.mubr.bf16.mxu1 %v857_v16 }
 0x215   : > { %2839 = vmatmul.mubr.bf16.gmra.mrb[4].mxu1 %v861_v17 }
 0x219   : > { %v841_v21 = vpop.permute.xlu1 %840 }
 0x21a   : > { %v839_v23 = vpop.permute.xlu0 %838  ;;  %v869_v46 = vsel %vm846_vm0, %v3306_v20, %v841_v21  ;;  %v3403_v20 = vld [vmem:[%s4249_s6] ss:$0 sm:$0xff] }
 0x21b   : > { %v865_v43 = vsel %vm846_vm0, %v3298_v9, %v839_v23 }
 0x21c   : > { %2842 = vmatprep.mubr.bf16.mxu1 %v865_v43 }
 0x21d   : > { %2843 = vmatmul.mubr.bf16.gmra.mrb[8].mxu1 %v869_v46 }
 0x221   : > { %v845_v24 = vpop.permute.xlu1 %844 }
 0x222   : > { %v843_v25 = vpop.permute.xlu0 %842  ;;  %v877_v0 = vsel %vm846_vm0, %v3318_v19, %v845_v24 }
 0x223   : > { %v873_v55 = vsel %vm846_vm0, %v3314_v30, %v843_v25 }
 0x224   : > { %2846 = vmatprep.mubr.bf16.mxu1 %v873_v55 }
 0x225   : > { %2847 = vmatmul.mubr.bf16.gmra.mrb[12].mxu1 %v877_v0 }
 0x2e0   : > { %v2836_v26 = vpop.f32.mrb[0].mxu1 }
 0x2e1   : > { %v984_v27 = vpop.f32.mrb[1].mxu1  ;;  %v993_v30 = vadd.f32 %v2836_v26, %v3403_v20 }
 0x2e2   : > { %v2837_v28 = vpop.f32.mrb[2].mxu1  ;;  %v985_v44 = vadd.f32 %v3403_v20, %v984_v27 }
 0x2e3   : > { %v987_v29 = vpop.f32.mrb[3].mxu1  ;;  %v996_v19 = vadd.f32 %v2837_v28, %v3403_v20  ;;  %v1081_v45 = vmul.f32 0.01, %v993_v30  ;;  %vm1065_vm1 = vcmp.gt.f32.partialorder %v993_v30, 0.0  ;;  %v1049_v57 = vmax.f32 %v993_v30, 0.0 }
 0x2e4   : > { %v988_v41 = vadd.f32 %v3403_v20, %v987_v29  ;;  %v1079_v54 = vmul.f32 0.01, %v985_v44  ;;  %vm1063_vm5 = vcmp.gt.f32.partialorder %v985_v44, 0.0  ;;  %v1047_v1 = vmax.f32 %v985_v44, 0.0 }
 0x2e5   : > { %v1082_v51 = vmul.f32 0.01, %v996_v19  ;;  %vm1066_vm4 = vcmp.gt.f32.partialorder %v996_v19, 0.0  ;;  %v1097_v58 = vsel %vm1065_vm1, %v993_v30, %v1081_v45  ;;  %v1050_v60 = vmax.f32 %v996_v19, 0.0 }
 0x2e6   : > { %v1080_v48 = vmul.f32 0.01, %v988_v41  ;;  %vm1064_vm2 = vcmp.gt.f32.partialorder %v988_v41, 0.0  ;;  %v1048_v59 = vmax.f32 %v988_v41, 0.0  ;;  %v1095_v4 = vsel %vm1063_vm5, %v985_v44, %v1079_v54 }
 0x2e7   : > { %v1098_v2 = vsel %vm1066_vm4, %v996_v19, %v1082_v51  ;;  %v3422_v5 = vsel %vm516_vm3, %v1049_v57, %v1097_v58  ;;  %v3439_v21 = vsel %vm516_vm3, %v1047_v1, %v1095_v4  ;;  %vm3151_vm4 = vmmov 0  }
 0x2e8   : > { %v2840_v9 = vpop.f32.mrb[4].mxu1  ;;  %v1096_v61 = vsel %vm1064_vm2, %v988_v41, %v1080_v48  ;;  %v3433_v11 = vsel %vm516_vm3, %v1050_v60, %v1098_v2  ;;  %v1169_v23 = vmul.f32 %v3422_v5, %v3422_v5  ;;  %v1129_v28 = vsel %vm846_vm0, %v3439_v21, 0.0 }
 0x2e9   : > { %v1000_v37 = vpop.f32.mrb[5].mxu1  ;;  %v1009_v49 = vadd.f32 %v2840_v9, %v3403_v20  ;;  %v3429_v10 = vsel %vm516_vm3, %v1048_v59, %v1096_v61  ;;  %v1170_v24 = vmul.f32 %v3433_v11, %v3433_v11  ;;  %v1132_v29 = vsel %vm846_vm0, %v3422_v5, 0.0 }
 0x2ea   : > { %v2841_v38 = vpop.f32.mrb[6].mxu1  ;;  %v1001_v52 = vadd.f32 %v3403_v20, %v1000_v37  ;;  %v1130_v46 = vsel %vm846_vm0, %v3429_v10, 0.0  ;;  %v1167_v37 = vmul.f32 %v3439_v21, %v3439_v21 }
 0x2eb   : > { %v1003_v40 = vpop.f32.mrb[7].mxu1  ;;  %v1085_v62 = vmul.f32 0.01, %v1009_v49  ;;  %v1012_v63 = vadd.f32 %v2841_v38, %v3403_v20  ;;  %vm1069_vm6 = vcmp.gt.f32.partialorder %v1009_v49, 0.0  ;;  %v1053_v6 = vmax.f32 %v1009_v49, 0.0 }
 0x2ec   : > { %v1083_v3 = vmul.f32 0.01, %v1001_v52  ;;  %vm1067_vm7 = vcmp.gt.f32.partialorder %v1001_v52, 0.0  ;;  %v1004_v7 = vadd.f32 %v3403_v20, %v1003_v40  ;;  %v1051_v13 = vmax.f32 %v1001_v52, 0.0 }
 0x2ed   : > { %v1101_v12 = vsel %vm1069_vm6, %v1009_v49, %v1085_v62  ;;  %v1086_v14 = vmul.f32 0.01, %v1012_v63  ;;  %vm1070_vm8 = vcmp.gt.f32.partialorder %v1012_v63, 0.0  ;;  %v1054_v55 = vmax.f32 %v1012_v63, 0.0 }
 0x2ee   : > { %v1099_v16 = vsel %vm1067_vm7, %v1001_v52, %v1083_v3  ;;  %v3449_v25 = vsel %vm516_vm3, %v1053_v6, %v1101_v12  ;;  %v1084_v0 = vmul.f32 0.01, %v1004_v7  ;;  %vm1068_vm9 = vcmp.gt.f32.partialorder %v1004_v7, 0.0 }
 0x2ef   : > { %v3453_v26 = vsel %vm516_vm3, %v1051_v13, %v1099_v16  ;;  %v1102_v27 = vsel %vm1070_vm8, %v1012_v63, %v1086_v14  ;;  %v1131_v9 = vadd.f32 %v1130_v46, %v1129_v28  ;;  %v1186_v38 = vsel %vm846_vm0, %v1169_v23, 0.0 }
 0x2f0   : > { %v3412_v47 = vpop.f32.mrb[8].mxu1  ;;  %v1173_v40 = vmul.f32 %v3449_v25, %v3449_v25  ;;  %v1052_v30 = vmax.f32 %v1004_v7, 0.0  ;;  %v1171_v19 = vmul.f32 %v3453_v26, %v3453_v26  ;;  %v3469_v44 = vsel %vm516_vm3, %v1054_v55, %v1102_v27 }
 0x2f1   : > { %v1016_v50 = vpop.f32.mrb[9].mxu1  ;;  %v1100_v45 = vsel %vm1068_vm9, %v1004_v7, %v1084_v0  ;;  %v1025_v48 = vadd.f32 %v3412_v47, %v3403_v20  ;;  %v1134_v49 = vsel %vm846_vm0, %v3433_v11, 0.0  ;;  %v1188_v51 = vsel %vm846_vm0, %v1170_v24, 0.0 }
 0x2f2   : > { %v3416_v53 = vpop.f32.mrb[10].mxu1  ;;  %v1017_v41 = vadd.f32 %v3403_v20, %v1016_v50  ;;  %v1168_v50 = vmul.f32 %v3429_v10, %v3429_v10  ;;  %v1140_v54 = vsel %vm846_vm0, %v3449_v25, 0.0  ;;  %v1136_v57 = vsel %vm846_vm0, %v3453_v26, 0.0 }
 0x2f3   : > { %v1019_v56 = vpop.f32.mrb[11].mxu1  ;;  %v1133_v58 = vadd.f32 %v1132_v29, %v1131_v9  ;;  %v1183_v59 = vsel %vm846_vm0, %v1167_v37, 0.0  ;;  %v3485_v47 = vsel %vm846_vm0, %v1173_v40, 0.0  ;;  %v1142_v60 = vsel %vm846_vm0, %v3469_v44, 0.0 }
 0x2f4   : > { %v1020_v52 = vadd.f32 %v3403_v20, %v1019_v56  ;;  %v3491_v56 = vsel %vm516_vm3, %v1052_v30, %v1100_v45  ;;  %v1087_v61 = vmul.f32 0.01, %v1017_v41  ;;  %v1190_v62 = vsel %vm846_vm0, %v1171_v19, 0.0 }
 0x2f5   : > { %v1174_v63 = vmul.f32 %v3469_v44, %v3469_v44  ;;  %v1089_v1 = vmul.f32 0.01, %v1025_v48  ;;  %vm1071_vm10 = vcmp.gt.f32.partialorder %v1017_v41, 0.0  ;;  %v1057_v2 = vmax.f32 %v1025_v48, 0.0 }
 0x2f6   : > { %vm1073_vm11 = vcmp.gt.f32.partialorder %v1025_v48, 0.0  ;;  %v1028_v3 = vadd.f32 %v3416_v53, %v3403_v20  ;;  %v1088_v4 = vmul.f32 0.01, %v1020_v52  ;;  %v1138_v6 = vsel %vm846_vm0, %v3491_v56, 0.0 }
 0x2f7   : > { %v1055_v7 = vmax.f32 %v1017_v41, 0.0  ;;  %vm1072_vm12 = vcmp.gt.f32.partialorder %v1020_v52, 0.0  ;;  %v1135_v12 = vadd.f32 %v1134_v49, %v1133_v58  ;;  %v1172_v13 = vmul.f32 %v3491_v56, %v3491_v56 }
 0x2f8   : > { %v3425_v8 = vpop.f32.mrb[12].mxu1  ;;  %v1103_v14 = vsel %vm1071_vm10, %v1017_v41, %v1087_v61  ;;  %v1184_v23 = vsel %vm846_vm0, %v1168_v50, 0.0  ;;  %v1105_v46 = vsel %vm1073_vm11, %v1025_v48, %v1089_v1  ;;  %v1056_v24 = vmax.f32 %v1020_v52, 0.0 }
 0x2f9   : > { %v1032_v15 = vpop.f32.mrb[13].mxu1  ;;  %v1137_v55 = vadd.f32 %v1136_v57, %v1135_v12  ;;  %v1185_v0 = vadd.f32 %v1184_v23, %v1183_v59  ;;  %v1196_v53 = vsel %vm846_vm0, %v1174_v63, 0.0  ;;  %v1090_v27 = vmul.f32 0.01, %v1028_v3 }
 0x2fa   : > { %v3435_v17 = vpop.f32.mrb[14].mxu1  ;;  %v1033_v16 = vadd.f32 %v3403_v20, %v1032_v15  ;;  %v1104_v28 = vsel %vm1072_vm12, %v1020_v52, %v1088_v4  ;;  %v3508_v9 = vsel %vm516_vm3, %v1055_v7, %v1103_v14  ;;  %vm1074_vm13 = vcmp.gt.f32.partialorder %v1028_v3, 0.0 }
 0x2fb   : > { %v1035_v43 = vpop.f32.mrb[15].mxu1  ;;  %v1139_v37 = vadd.f32 %v1138_v6, %v1137_v55  ;;  %v1187_v40 = vadd.f32 %v1186_v38, %v1185_v0  ;;  %v1192_v15 = vsel %vm846_vm0, %v1172_v13, 0.0  ;;  %v3513_v30 = vsel %vm516_vm3, %v1057_v2, %v1105_v46 }
 0x2fc   : > { %v1036_v29 = vadd.f32 %v3403_v20, %v1035_v43  ;;  %v1058_v41 = vmax.f32 %v1028_v3, 0.0  ;;  %v1091_v19 = vmul.f32 0.01, %v1033_v16  ;;  %v3517_v45 = vsel %vm516_vm3, %v1056_v24, %v1104_v28 }
 0x2fd   : > { %vm1075_vm14 = vcmp.gt.f32.partialorder %v1033_v16, 0.0  ;;  %v1141_v43 = vadd.f32 %v1140_v54, %v1139_v37  ;;  %v1189_v48 = vadd.f32 %v1188_v51, %v1187_v40  ;;  %v1144_v49 = vsel %vm846_vm0, %v3508_v9, 0.0 }
 0x2fe   : > { %v1106_v52 = vsel %vm1074_vm13, %v1028_v3, %v1090_v27  ;;  %v1041_v38 = vadd.f32 %v3425_v8, %v3403_v20  ;;  %v1092_v50 = vmul.f32 0.01, %v1036_v29  ;;  %v1059_v57 = vmax.f32 %v1033_v16, 0.0 }
 0x2ff   : > { %vm1076_vm15 = vcmp.gt.f32.partialorder %v1036_v29, 0.0  ;;  %v1143_v58 = vadd.f32 %v1142_v60, %v1141_v43  ;;  %v1191_v59 = vadd.f32 %v1190_v62, %v1189_v48  ;;  %v1175_v61 = vmul.f32 %v3508_v9, %v3508_v9 }
 0x300   : > { %v1146_v63 = vsel %vm846_vm0, %v3517_v45, 0.0  ;;  %v1107_v54 = vsel %vm1075_vm14, %v1033_v16, %v1091_v19  ;;  %v1044_v51 = vadd.f32 %v3435_v17, %v3403_v20  ;;  %v1148_v1 = vsel %vm846_vm0, %v3513_v30, 0.0 }
 0x301   : > { %v1060_v2 = vmax.f32 %v1036_v29, 0.0  ;;  %v1145_v8 = vadd.f32 %v1144_v49, %v1143_v58  ;;  %v1193_v3 = vadd.f32 %v1192_v15, %v1191_v59  ;;  %v3533_v60 = vsel %vm516_vm3, %v1058_v41, %v1106_v52 }
 0x302   : > { %v1176_v62 = vmul.f32 %v3517_v45, %v3517_v45  ;;  %v1093_v4 = vmul.f32 0.01, %v1041_v38  ;;  %v1108_v6 = vsel %vm1076_vm15, %v1036_v29, %v1092_v50  ;;  %vm1077_vm1 = vcmp.gt.f32.partialorder %v1041_v38, 0.0 }
 0x303   : > { %v3539_v7 = vsel %vm516_vm3, %v1059_v57, %v1107_v54  ;;  %v1147_v20 = vadd.f32 %v1146_v63, %v1145_v8  ;;  %v1195_v17 = vadd.f32 %v3485_v47, %v1193_v3  ;;  %v1177_v12 = vmul.f32 %v3513_v30, %v3513_v30 }
 0x304   : > { %v1198_v13 = vsel %vm846_vm0, %v1175_v61, 0.0  ;;  %v1061_v14 = vmax.f32 %v1041_v38, 0.0  ;;  %v1094_v16 = vmul.f32 0.01, %v1044_v51  ;;  %vm1078_vm2 = vcmp.gt.f32.partialorder %v1044_v51, 0.0 }
 0x305   : > { %v3547_v23 = vsel %vm516_vm3, %v1060_v2, %v1108_v6  ;;  %v1149_v46 = vadd.f32 %v1148_v1, %v1147_v20  ;;  %v1197_v24 = vadd.f32 %v1196_v53, %v1195_v17  ;;  %v1150_v55 = vsel %vm846_vm0, %v3533_v60, 0.0 }
 0x306   : > { %v1200_v0 = vsel %vm846_vm0, %v1176_v62, 0.0  ;;  %v1109_v47 = vsel %vm1077_vm1, %v1041_v38, %v1093_v4  ;;  %v1152_v27 = vsel %vm846_vm0, %v3539_v7, 0.0  ;;  %v1062_v28 = vmax.f32 %v1044_v51, 0.0 }
 0x307   : > { %v1151_v29 = vadd.f32 %v1150_v55, %v1149_v46  ;;  %v1199_v37 = vadd.f32 %v1198_v13, %v1197_v24  ;;  %v1178_v40 = vmul.f32 %v3533_v60, %v3533_v60  ;;  %v1179_v15 = vmul.f32 %v3539_v7, %v3539_v7 }
 0x308   : > { %v1110_v41 = vsel %vm1078_vm2, %v1044_v51, %v1094_v16  ;;  %v1154_v53 = vsel %vm846_vm0, %v3547_v23, 0.0  ;;  %v3562_v19 = vsel %vm516_vm3, %v1061_v14, %v1109_v47  ;;  %v1202_v49 = vsel %vm846_vm0, %v1177_v12, 0.0 }
 0x309   : > { %v1153_v43 = vadd.f32 %v1152_v27, %v1151_v29  ;;  %v1201_v48 = vadd.f32 %v1200_v0, %v1199_v37  ;;  %v1180_v52 = vmul.f32 %v3547_v23, %v3547_v23  ;;  %v3569_v38 = vsel %vm516_vm3, %v1062_v28, %v1110_v41 }
 0x30a   : > { %v1204_v58 = vsel %vm846_vm0, %v1178_v40, 0.0  ;;  %v1156_v59 = vsel %vm846_vm0, %v3562_v19, 0.0  ;;  %v1206_v61 = vsel %vm846_vm0, %v1179_v15, 0.0  ;;  %v1181_v51 = vmul.f32 %v3562_v19, %v3562_v19 }
 0x30b   : > { %v1155_v50 = vadd.f32 %v1154_v53, %v1153_v43  ;;  %v1203_v57 = vadd.f32 %v1202_v49, %v1201_v48  ;;  %v1158_v1 = vsel %vm846_vm0, %v3569_v38, 0.0  ;;  %v1208_v2 = vsel %vm846_vm0, %v1180_v52, 0.0  ;;  %v3588_v52 = vld [vmem:[%s4250_s7] sm:$0x1] }
 0x30c   : > { %v1182_v62 = vmul.f32 %v3569_v38, %v3569_v38  ;;  %v1210_v20 = vsel %vm846_vm0, %v1181_v51, 0.0  ;;  %v1231_v49 = vshrl.u32 %v514_v39, 7 }
 0x30d   : > { %v1157_v63 = vadd.f32 %v1156_v59, %v1155_v50  ;;  %v1205_v54 = vadd.f32 %v1204_v58, %v1203_v57  ;;  %v3596_v59 = vld [vmem:[%s4251_s8] sm:$0x1] }
 0x30e   : > { %v1212_v13 = vsel %vm846_vm0, %v1182_v62, 0.0  ;;  %v3590_v50 = vsub.s32 0, %v1231_v49 }
 0x30f   : > { %v1159_v8 = vadd.f32 %v1158_v1, %v1157_v63  ;;  %v1207_v3 = vadd.f32 %v1206_v61, %v1205_v54 }
 0x311   : > { %v1160_v4 = vrot.slane %v1159_v8, 4  ;;  %v1209_v6 = vadd.f32 %v1208_v2, %v1207_v3 }
 0x313   : > { %v1161_v17 = vadd.f32 %v1160_v4, %v1159_v8  ;;  %v1211_v12 = vadd.f32 %v1210_v20, %v1209_v6 }
 0x315   : > { %v1162_v14 = vrot.slane %v1161_v17, 2  ;;  %v1213_v16 = vadd.f32 %v1212_v13, %v1211_v12 }
 0x317   : > { %v1163_v46 = vadd.f32 %v1162_v14, %v1161_v17  ;;  %v1214_v24 = vrot.slane %v1213_v16, 4 }
 0x319   : > { %v1164_v55 = vrot.slane %v1163_v46, 1  ;;  %v1215_v0 = vadd.f32 %v1214_v24, %v1213_v16 }
 0x31b   : > { %v1165_v47 = vadd.f32 %v1164_v55, %v1163_v46  ;;  %v1216_v27 = vrot.slane %v1215_v0, 2 }
 0x31d   : > { %v1166_v28 = vmul.f32 0.0078125, %v1165_v47  ;;  %v1217_v29 = vadd.f32 %v1216_v27, %v1215_v0 }
 0x31f   : > { %v1218_v37 = vrot.slane %v1217_v29, 1  ;;  %v1221_v15 = vmul.f32 %v1166_v28, %v1166_v28 }
 0x321   : > { %v1219_v40 = vadd.f32 %v1218_v37, %v1217_v29 }
 0x323   : > { %v1220_v41 = vmul.f32 0.0078125, %v1219_v40 }
 0x325   : > { %v1222_v53 = vsub.f32 %v1220_v41, %v1221_v15 }
 0x327   : > { %v1223_v43 = vmax.f32 %v1222_v53, 0.0 }
 0x329   : > { %v1224_v48 = vadd.f32 1e-05, %v1223_v43 }
 0x32b   : > { %3061 = vrsqrt.f32 %v1224_v48 }
 0x335   : > { %v3062_v57 = vpop.eup %3061 }
 0x336   : > { %v1226_v58 = vmul.f32 %v3062_v57, %v3588_v52 }
 0x338   : > { %v1227_v61 = vmul.f32 %v1226_v58, %v1166_v28  ;;  %v1233_v63 = vrot.slane %v1226_v58, %v3590_v50 }
 0x33a   : > { %v1228_v39 = vsub.f32 %v3596_v59, %v1227_v61  ;;  %v1235_v54 = vmul.f32 %v1233_v63, %v3439_v21  ;;  %v1236_v51 = vmul.f32 %v1233_v63, %v3429_v10  ;;  %v1237_v2 = vmul.f32 %v1233_v63, %v3422_v5 }
 0x33b   : > { %v1238_v8 = vmul.f32 %v1233_v63, %v3433_v11  ;;  %v1239_v17 = vmul.f32 %v1233_v63, %v3453_v26  ;;  %v1240_v12 = vmul.f32 %v1233_v63, %v3491_v56  ;;  %v1241_v5 = vmul.f32 %v1233_v63, %v3449_v25 }
 0x33c   : > { %v1255_v1 = vrot.slane %v1228_v39, %v3590_v50  ;;  %v1242_v11 = vmul.f32 %v1233_v63, %v3469_v44  ;;  %v1243_v56 = vmul.f32 %v1233_v63, %v3508_v9  ;;  %v1244_v46 = vmul.f32 %v1233_v63, %v3517_v45 }
 0x33d   : > { %v1245_v25 = vmul.f32 %v1233_v63, %v3513_v30  ;;  %v1246_v44 = vmul.f32 %v1233_v63, %v3533_v60  ;;  %v1247_v9 = vmul.f32 %v1233_v63, %v3539_v7  ;;  %v1248_v45 = vmul.f32 %v1233_v63, %v3547_v23  ;;  %v3040_v23 = vld [vmem:[%s4248_s5 + $0x40] sm:$0xff]  }
 0x33e   : > { %v1257_v3 = vadd.f32 %v1255_v1, %v1235_v54  ;;  %v1258_v62 = vadd.f32 %v1255_v1, %v1236_v51  ;;  %v1259_v4 = vadd.f32 %v1255_v1, %v1237_v2  ;;  %v1260_v6 = vadd.f32 %v1255_v1, %v1238_v8  ;;  %2882 = vmatprep.subr.bf16.mxu1 %v3040_v23 }
 0x33f   : > { %v1261_v10 = vadd.f32 %v1255_v1, %v1239_v17  ;;  %v1262_v13 = vadd.f32 %v1255_v1, %v1240_v12  ;;  %v1263_v16 = vadd.f32 %v1255_v1, %v1241_v5  ;;  %v1264_v26 = vadd.f32 %v1255_v1, %v1242_v11  ;;  %2883 = vmatpush3.bf16.msra.mxu1 %v3040_v23 }
 0x340   : > { %v3605_v20 = vpack.c.bf16 %v1258_v62, %v1257_v3  ;;  %v3610_v21 = vpack.c.bf16 %v1260_v6, %v1259_v4  ;;  %v1265_v55 = vadd.f32 %v1255_v1, %v1243_v56  ;;  %v1266_v0 = vadd.f32 %v1255_v1, %v1244_v46 }
 0x341   : > { %v3616_v14 = vpack.c.bf16 %v1262_v13, %v1261_v10  ;;  %v3622_v24 = vpack.c.bf16 %v1264_v26, %v1263_v16  ;;  %v1267_v27 = vadd.f32 %v1255_v1, %v1245_v25  ;;  %v1268_v28 = vadd.f32 %v1255_v1, %v1246_v44 }
 0x342   : > { %2850 = vmatprep.subr.bf16.mxu0 %v3605_v20  ;;  %v3628_v47 = vpack.c.bf16 %v1266_v0, %v1265_v55  ;;  %v1269_v37 = vadd.f32 %v1255_v1, %v1247_v9  ;;  %v1270_v40 = vadd.f32 %v1255_v1, %v1248_v45  ;;  %v1249_v30 = vmul.f32 %v1233_v63, %v3562_v19  ;;  %v3708_v9 = vld [vmem:[%s4249_s6 + $0x1] ss:$0 sm:$0xff] }
 0x343   : > { %2851 = vmatpush3.bf16.msra.mxu0 %v3605_v20  ;;  %v3634_v29 = vpack.c.bf16 %v1268_v28, %v1267_v27  ;;  %v1250_v60 = vmul.f32 %v1233_v63, %v3569_v38 }
 0x344   : > { %2852 = vmatprep.subr.bf16.mxu0 %v3610_v21  ;;  %v3640_v15 = vpack.c.bf16 %v1270_v40, %v1269_v37  ;;  %v1271_v41 = vadd.f32 %v1255_v1, %v1249_v30 }
 0x345   : > { %v1272_v53 = vadd.f32 %v1255_v1, %v1250_v60 }
 0x347   : > { %2853 = vmatpush3.bf16.msra.mxu0 %v3610_v21  ;;  %v3644_v7 = vpack.c.bf16 %v1272_v53, %v1271_v41 }
 0x348   : > { %2854 = vmatprep.subr.bf16.mxu0 %v3616_v14 }
 0x34b   : > { %2855 = vmatpush3.bf16.msra.mxu0 %v3616_v14 }
 0x34c   : > { %2856 = vmatprep.subr.bf16.mxu0 %v3622_v24 }
 0x34f   : > { %2857 = vmatpush3.bf16.msra.mxu0 %v3622_v24 }
 0x350   : > { %2858 = vmatprep.subr.bf16.mxu0 %v3628_v47 }
 0x353   : > { %2859 = vmatpush3.bf16.msra.mxu0 %v3628_v47 }
 0x354   : > { %2860 = vmatprep.subr.bf16.mxu0 %v3634_v29 }
 0x357   : > { %2861 = vmatpush3.bf16.msra.mxu0 %v3634_v29 }
 0x358   : > { %2862 = vmatprep.subr.bf16.mxu0 %v3640_v15 }
 0x35b   : > { %2863 = vmatpush3.bf16.msra.mxu0 %v3640_v15 }
 0x35c   : > { %2864 = vmatprep.subr.bf16.mxu0 %v3644_v7 }
 0x35f   : > { %2865 = vmatpush3.bf16.msra.mxu0 %v3644_v7 }
 0x362   : > { %2867 = vmatmul.mubr.bf16.vlgmr.msra.gmra.mrb[16].mxu0 %v3323_v22  ;;  %v3041_v22 = vld [vmem:[%s4248_s5 + $0x48] sm:$0xff]  }
 0x363   : > { %2870 = vmatprep.mubr.bf16.mxu0 %v3327_v31  ;;  %2884 = vmatprep.subr.bf16.mxu1 %v3041_v22  ;;  %v3042_v31 = vld [vmem:[%s4248_s5 + $0x50] sm:$0xff]  }
 0x364   : > { %2885 = vmatpush3.bf16.msra.mxu1 %v3041_v22 }
 0x365   : > { %2886 = vmatprep.subr.bf16.mxu1 %v3042_v31 }
 0x368   : > { %2887 = vmatpush3.bf16.msra.mxu1 %v3042_v31 }
 0x36a   : > { %2871 = vmatmul.mubr.bf16.gmra.mrb[20].mxu0 %v3332_v32  ;;  %v3044_v32 = vld [vmem:[%s4248_s5 + $0x60] sm:$0xff]  }
 0x36b   : > { %2874 = vmatprep.mubr.bf16.mxu0 %v3335_v33  ;;  %v3045_v33 = vld [vmem:[%s4248_s5 + $0x68] sm:$0xff]  }
 0x372   : > { %2875 = vmatmul.mubr.bf16.gmra.mrb[24].mxu0 %v3340_v34  ;;  %v3046_v34 = vld [vmem:[%s4248_s5 + $0x70] sm:$0xff]  }
 0x373   : > { %2878 = vmatprep.mubr.bf16.mxu0 %v3343_v35  ;;  %v3047_v35 = vld [vmem:[%s4248_s5 + $0x78] sm:$0xff]  }
 0x37a   : > { %2879 = vmatmul.mubr.bf16.gmra.mrb[28].mxu0 %v3348_v36 }
 0x37b   : > { %2930 = vmatprep.mubr.bf16.mxu0 %v3246_v18  ;;  %v3043_v18 = vld [vmem:[%s4248_s5 + $0x58] sm:$0xff]  }
 0x37c   : > { %2888 = vmatprep.subr.bf16.mxu1 %v3043_v18 }
 0x37d   : > { %2889 = vmatpush3.bf16.msra.mxu1 %v3043_v18 }
 0x37e   : > { %2890 = vmatprep.subr.bf16.mxu1 %v3044_v32 }
 0x381   : > { %2891 = vmatpush3.bf16.msra.mxu1 %v3044_v32 }
 0x382   : > { %2892 = vmatprep.subr.bf16.mxu1 %v3045_v33 }
 0x385   : > { %2893 = vmatpush3.bf16.msra.mxu1 %v3045_v33 }
 0x386   : > { %2894 = vmatprep.subr.bf16.mxu1 %v3046_v34 }
 0x389   : > { %2895 = vmatpush3.bf16.msra.mxu1 %v3046_v34 }
 0x38a   : > { %2896 = vmatprep.subr.bf16.mxu1 %v3047_v35 }
 0x38d   : > { %2897 = vmatpush3.bf16.msra.mxu1 %v3047_v35 }
 0x435   : > { %v2868_v36 = vpop.f32.mrb[16].mxu0 }
 0x436   : > { %v1315_v19 = vpop.f32.mrb[17].mxu0 }
 0x437   : > { %v2869_v38 = vpop.f32.mrb[18].mxu0 }
 0x438   : > { %v1379_v43 = vpack.c.bf16 %v2869_v38, %v2868_v36  ;;  %v1318_v48 = vpop.f32.mrb[19].mxu0 }
 0x439   : > { %v1378_v49 = vpack.c.bf16 %v1318_v48, %v1315_v19 }
 0x43a   : > { %1396 = vrot.lane.b32.xlu1 %v1379_v43, %s3149_s24 }
 0x43b   : > { %1394 = vrot.lane.b32.xlu0 %v1378_v49, %s3149_s24 }
 0x43d   : > { %v2872_v57 = vpop.f32.mrb[20].mxu0 }
 0x43e   : > { %v1331_v58 = vpop.f32.mrb[21].mxu0 }
 0x43f   : > { %v2873_v61 = vpop.f32.mrb[22].mxu0 }
 0x440   : > { %v1381_v63 = vpack.c.bf16 %v2873_v61, %v2872_v57  ;;  %v1334_v39 = vpop.f32.mrb[23].mxu0 }
 0x441   : > { %v1380_v54 = vpack.c.bf16 %v1334_v39, %v1331_v58 }
 0x442   : > { %1400 = vrot.lane.b32.xlu1 %v1381_v63, %s3149_s24 }
 0x443   : > { %1398 = vrot.lane.b32.xlu0 %v1380_v54, %s3149_s24 }
 0x445   : > { %v2876_v51 = vpop.f32.mrb[24].mxu0 }
 0x446   : > { %v1347_v1 = vpop.f32.mrb[25].mxu0 }
 0x447   : > { %v2877_v2 = vpop.f32.mrb[26].mxu0 }
 0x448   : > { %v1383_v8 = vpack.c.bf16 %v2877_v2, %v2876_v51  ;;  %v1350_v3 = vpop.f32.mrb[27].mxu0 }
 0x449   : > { %v1382_v62 = vpack.c.bf16 %v1350_v3, %v1347_v1 }
 0x44a   : > { %1404 = vrot.lane.b32.xlu1 %v1383_v8, %s3149_s24 }
 0x44b   : > { %1402 = vrot.lane.b32.xlu0 %v1382_v62, %s3149_s24 }
 0x44d   : > { %v2880_v4 = vpop.f32.mrb[28].mxu0 }
 0x44e   : > { %v1363_v6 = vpop.f32.mrb[29].mxu0 }
 0x44f   : > { %v2881_v17 = vpop.f32.mrb[30].mxu0 }
 0x450   : > { %v1385_v12 = vpack.c.bf16 %v2881_v17, %v2880_v4  ;;  %v1366_v10 = vpop.f32.mrb[31].mxu0 }
 0x451   : > { %v1384_v13 = vpack.c.bf16 %v1366_v10, %v1363_v6 }
 0x452   : > { %1408 = vrot.lane.b32.xlu1 %v1385_v12, %s3149_s24 }
 0x453   : > { %1406 = vrot.lane.b32.xlu0 %v1384_v13, %s3149_s24 }
 0x4ac   : > { %v1397_v5 = vpop.permute.xlu1 %1396 }
 0x4ad   : > { %v1395_v11 = vpop.permute.xlu0 %1394  ;;  %v1416_v26 = vsel %vm846_vm0, %v3610_v21, %v1397_v5 }
 0x4ae   : > { %v1412_v16 = vsel %vm846_vm0, %v3605_v20, %v1395_v11 }
 0x4af   : > { %2898 = vmatprep.mubr.bf16.mxu1 %v1412_v16 }
 0x4b0   : > { %2899 = vmatmul.mubr.bf16.vlgmr.msra.gmra.mrb[16].mxu1 %v1416_v26 }
 0x4b4   : > { %v1401_v56 = vpop.permute.xlu1 %1400 }
 0x4b5   : > { %v1399_v46 = vpop.permute.xlu0 %1398  ;;  %v1424_v0 = vsel %vm846_vm0, %v3622_v24, %v1401_v56 }
 0x4b6   : > { %v1420_v55 = vsel %vm846_vm0, %v3616_v14, %v1399_v46 }
 0x4b7   : > { %2902 = vmatprep.mubr.bf16.mxu1 %v1420_v55 }
 0x4b8   : > { %2903 = vmatmul.mubr.bf16.gmra.mrb[20].mxu1 %v1424_v0 }
 0x4bc   : > { %v1405_v25 = vpop.permute.xlu1 %1404 }
 0x4bd   : > { %v1403_v44 = vpop.permute.xlu0 %1402  ;;  %v1432_v21 = vsel %vm846_vm0, %v3634_v29, %v1405_v25 }
 0x4be   : > { %v1428_v20 = vsel %vm846_vm0, %v3628_v47, %v1403_v44 }
 0x4bf   : > { %2906 = vmatprep.mubr.bf16.mxu1 %v1428_v20 }
 0x4c0   : > { %2907 = vmatmul.mubr.bf16.gmra.mrb[24].mxu1 %v1432_v21 }
 0x4c4   : > { %v1409_v27 = vpop.permute.xlu1 %1408 }
 0x4c5   : > { %v1407_v28 = vpop.permute.xlu0 %1406  ;;  %v1440_v24 = vsel %vm846_vm0, %v3644_v7, %v1409_v27 }
 0x4c6   : > { %v1436_v14 = vsel %vm846_vm0, %v3640_v15, %v1407_v28 }
 0x4c7   : > { %2910 = vmatprep.mubr.bf16.mxu1 %v1436_v14 }
 0x4c8   : > { %2911 = vmatmul.mubr.bf16.gmra.mrb[28].mxu1 %v1440_v24 }
 0x583   : > { %v2900_v47 = vpop.f32.mrb[16].mxu1 }
 0x584   : > { %v1558_v45 = vadd.f32 %v2900_v47, %v3708_v9  ;;  %v1549_v29 = vpop.f32.mrb[17].mxu1 }
 0x585   : > { %v1550_v37 = vadd.f32 %v3708_v9, %v1549_v29  ;;  %v2901_v40 = vpop.f32.mrb[18].mxu1 }
 0x586   : > { %3063 = vtanh.f32 %v1558_v45  ;;  %v1561_v30 = vadd.f32 %v2901_v40, %v3708_v9  ;;  %v1552_v60 = vpop.f32.mrb[19].mxu1  ;;  %v1630_v32 = vmax.f32 %v1558_v45, 0.0 }
 0x587   : > { %3065 = vtanh.f32 %v1550_v37  ;;  %v1553_v15 = vadd.f32 %v3708_v9, %v1552_v60  ;;  %v1628_v35 = vmax.f32 %v1550_v37, 0.0 }
 0x588   : > { %3067 = vtanh.f32 %v1561_v30  ;;  %v1631_v38 = vmax.f32 %v1561_v30, 0.0 }
 0x589   : > { %3069 = vtanh.f32 %v1553_v15  ;;  %v1629_v49 = vmax.f32 %v1553_v15, 0.0 }
 0x58b   : > { %v2904_v41 = vpop.f32.mrb[20].mxu1 }
 0x58c   : > { %v1574_v53 = vadd.f32 %v2904_v41, %v3708_v9  ;;  %v1565_v7 = vpop.f32.mrb[21].mxu1 }
 0x58d   : > { %v1566_v23 = vadd.f32 %v3708_v9, %v1565_v7  ;;  %v2905_v22 = vpop.f32.mrb[22].mxu1 }
 0x58e   : > { %3071 = vtanh.f32 %v1574_v53  ;;  %v1577_v31 = vadd.f32 %v2905_v22, %v3708_v9  ;;  %v1568_v18 = vpop.f32.mrb[23].mxu1  ;;  %v1634_v51 = vmax.f32 %v1574_v53, 0.0 }
 0x58f   : > { %3073 = vtanh.f32 %v1566_v23  ;;  %v1569_v33 = vadd.f32 %v3708_v9, %v1568_v18  ;;  %v1632_v1 = vmax.f32 %v1566_v23, 0.0 }
 0x590   : > { %v3064_v34 = vpop.eup %3063  ;;  %3075 = vtanh.f32 %v1577_v31  ;;  %v1635_v10 = vmax.f32 %v1577_v31, 0.0 }
 0x591   : > { %v3066_v36 = vpop.eup %3065  ;;  %v3720_v19 = vsel %vm516_vm3, %v3064_v34, %v1630_v32  ;;  %3077 = vtanh.f32 %v1569_v33  ;;  %v1633_v25 = vmax.f32 %v1569_v33, 0.0 }
 0x592   : > { %v3068_v43 = vpop.eup %3067  ;;  %v3724_v48 = vsel %vm516_vm3, %v3066_v36, %v1628_v35  ;;  %v1700_v39 = vmul.f32 %v3720_v19, %v3720_v19  ;;  %v1663_v11 = vsel %vm846_vm0, %v3720_v19, 0.0 }
 0x593   : > { %v3070_v57 = vpop.eup %3069  ;;  %v1698_v58 = vmul.f32 %v3724_v48, %v3724_v48  ;;  %v3730_v61 = vsel %vm516_vm3, %v3068_v43, %v1631_v38  ;;  %v2908_v63 = vpop.f32.mrb[24].mxu1  ;;  %v1660_v8 = vsel %vm846_vm0, %v3724_v48, 0.0 }
 0x594   : > { %v3736_v54 = vsel %vm516_vm3, %v3070_v57, %v1629_v49  ;;  %v1581_v2 = vpop.f32.mrb[25].mxu1  ;;  %v3745_v4 = vadd.f32 %v2908_v63, %v3708_v9  ;;  %v1701_v17 = vmul.f32 %v3730_v61, %v3730_v61  ;;  %v1717_v20 = vsel %vm846_vm0, %v1700_v39, 0.0 }
 0x595   : > { %v1661_v3 = vsel %vm846_vm0, %v3736_v54, 0.0  ;;  %v1699_v62 = vmul.f32 %v3736_v54, %v3736_v54  ;;  %v2909_v6 = vpop.f32.mrb[26].mxu1  ;;  %v1582_v13 = vadd.f32 %v3708_v9, %v1581_v2  ;;  %v1714_v16 = vsel %vm846_vm0, %v1698_v58, 0.0 }
 0x596   : > { %v1662_v12 = vadd.f32 %v1661_v3, %v1660_v8  ;;  %v1584_v5 = vpop.f32.mrb[27].mxu1  ;;  %v3755_v56 = vadd.f32 %v2909_v6, %v3708_v9  ;;  %v1665_v21 = vsel %vm846_vm0, %v3730_v61, 0.0  ;;  %v1719_v14 = vsel %vm846_vm0, %v1701_v17, 0.0 }
 0x597   : > { %v1715_v26 = vsel %vm846_vm0, %v1699_v62, 0.0  ;;  %3079 = vtanh.f32 %v1582_v13  ;;  %v3762_v27 = vadd.f32 %v3708_v9, %v1584_v5 }
 0x598   : > { %v3072_v46 = vpop.eup %3071  ;;  %v1664_v55 = vadd.f32 %v1663_v11, %v1662_v12  ;;  %v1716_v0 = vadd.f32 %v1715_v26, %v1714_v16  ;;  %3081 = vtanh.f32 %v3745_v4 }
 0x599   : > { %v3074_v44 = vpop.eup %3073  ;;  %v3767_v47 = vsel %vm516_vm3, %v3072_v46, %v1634_v51  ;;  %3083 = vtanh.f32 %v3755_v56  ;;  %v1638_v51 = vmax.f32 %v3745_v4, 0.0  ;;  %v1639_v46 = vmax.f32 %v3755_v56, 0.0 }
 0x59a   : > { %v3076_v28 = vpop.eup %3075  ;;  %v1718_v24 = vadd.f32 %v1717_v20, %v1716_v0  ;;  %v3771_v45 = vsel %vm516_vm3, %v3074_v44, %v1632_v1  ;;  %v1666_v37 = vadd.f32 %v1665_v21, %v1664_v55  ;;  %3085 = vtanh.f32 %v3762_v27 }
 0x59b   : > { %v3078_v29 = vpop.eup %3077  ;;  %v1667_v40 = vsel %vm846_vm0, %v3771_v45, 0.0  ;;  %v1702_v30 = vmul.f32 %v3771_v45, %v3771_v45  ;;  %v2912_v60 = vpop.f32.mrb[28].mxu1  ;;  %v3780_v41 = vsel %vm516_vm3, %v3076_v28, %v1635_v10  ;;  %v1704_v18 = vmul.f32 %v3767_v47, %v3767_v47 }
 0x59c   : > { %v1720_v15 = vadd.f32 %v1719_v14, %v1718_v24  ;;  %v1597_v53 = vpop.f32.mrb[29].mxu1  ;;  %v1668_v7 = vadd.f32 %v1667_v40, %v1666_v37  ;;  %v3785_v22 = vsel %vm516_vm3, %v3078_v29, %v1633_v25  ;;  %v1606_v38 = vadd.f32 %v2912_v60, %v3708_v9 }
 0x59d   : > { %v1721_v23 = vsel %vm846_vm0, %v1702_v30, 0.0  ;;  %v2913_v31 = vpop.f32.mrb[30].mxu1  ;;  %v1669_v33 = vsel %vm846_vm0, %v3785_v22, 0.0  ;;  %v1703_v34 = vmul.f32 %v3785_v22, %v3785_v22  ;;  %v1598_v43 = vadd.f32 %v3708_v9, %v1597_v53 }
 0x59e   : > { %v1722_v32 = vadd.f32 %v1721_v23, %v1720_v15  ;;  %v1600_v35 = vpop.f32.mrb[31].mxu1  ;;  %v1670_v36 = vadd.f32 %v1669_v33, %v1668_v7  ;;  %v1671_v49 = vsel %vm846_vm0, %v3767_v47, 0.0  ;;  %v1705_v57 = vmul.f32 %v3780_v41, %v3780_v41 }
 0x59f   : > { %v1723_v58 = vsel %vm846_vm0, %v1703_v34, 0.0  ;;  %v1636_v1 = vmax.f32 %v1582_v13, 0.0  ;;  %v1725_v8 = vsel %vm846_vm0, %v1704_v18, 0.0  ;;  %v1673_v3 = vsel %vm846_vm0, %v3780_v41, 0.0 }
 0x5a0   : > { %v1672_v63 = vadd.f32 %v1671_v49, %v1670_v36  ;;  %v1724_v39 = vadd.f32 %v1723_v58, %v1722_v32  ;;  %3087 = vtanh.f32 %v1598_v43  ;;  %v1609_v62 = vadd.f32 %v2913_v31, %v3708_v9 }
 0x5a1   : > { %v3080_v2 = vpop.eup %3079  ;;  %3089 = vtanh.f32 %v1606_v38  ;;  %v1601_v10 = vadd.f32 %v3708_v9, %v1600_v35  ;;  %v1727_v4 = vsel %vm846_vm0, %v1705_v57, 0.0  ;;  %v1637_v55 = vmax.f32 %v3762_v27, 0.0 }
 0x5a2   : > { %v3082_v6 = vpop.eup %3081  ;;  %v1726_v17 = vadd.f32 %v1725_v8, %v1724_v39  ;;  %v3808_v12 = vsel %vm516_vm3, %v3080_v2, %v1636_v1  ;;  %v1674_v13 = vadd.f32 %v1673_v3, %v1672_v63  ;;  %3091 = vtanh.f32 %v1609_v62 }
 0x5a3   : > { %v1675_v5 = vsel %vm846_vm0, %v3808_v12, 0.0  ;;  %v1706_v11 = vmul.f32 %v3808_v12, %v3808_v12  ;;  %v3084_v16 = vpop.eup %3083  ;;  %v3820_v0 = vsel %vm516_vm3, %v3082_v6, %v1638_v51  ;;  %3093 = vtanh.f32 %v1601_v10 }
 0x5a4   : > { %v1728_v26 = vadd.f32 %v1727_v4, %v1726_v17  ;;  %v1676_v9 = vadd.f32 %v1675_v5, %v1674_v13  ;;  %v3086_v44 = vpop.eup %3085  ;;  %v3825_v21 = vsel %vm516_vm3, %v3084_v16, %v1639_v46  ;;  %v1708_v27 = vmul.f32 %v3820_v0, %v3820_v0 }
 0x5a5   : > { %v1729_v25 = vsel %vm846_vm0, %v1706_v11, 0.0  ;;  %v3829_v56 = vsel %vm516_vm3, %v3086_v44, %v1637_v55  ;;  %v1679_v29 = vsel %vm846_vm0, %v3820_v0, 0.0  ;;  %v1709_v37 = vmul.f32 %v3825_v21, %v3825_v21 }
 0x5a6   : > { %v1730_v20 = vadd.f32 %v1729_v25, %v1728_v26  ;;  %v1677_v28 = vsel %vm846_vm0, %v3829_v56, 0.0  ;;  %v1707_v14 = vmul.f32 %v3829_v56, %v3829_v56  ;;  %v1640_v30 = vmax.f32 %v1598_v43, 0.0 }
 0x5a7   : > { %v1678_v24 = vadd.f32 %v1677_v28, %v1676_v9  ;;  %v1733_v23 = vsel %vm846_vm0, %v1708_v27, 0.0  ;;  %v1681_v31 = vsel %vm846_vm0, %v3825_v21, 0.0  ;;  %v1642_v18 = vmax.f32 %v1606_v38, 0.0 }
 0x5a8   : > { %v1731_v40 = vsel %vm846_vm0, %v1707_v14, 0.0  ;;  %v1735_v43 = vsel %vm846_vm0, %v1709_v37, 0.0  ;;  %v1643_v49 = vmax.f32 %v1609_v62, 0.0  ;;  %v1641_v57 = vmax.f32 %v1601_v10, 0.0 }
 0x5a9   : > { %v1680_v15 = vadd.f32 %v1679_v29, %v1678_v24  ;;  %v1732_v53 = vadd.f32 %v1731_v40, %v1730_v20 }
 0x5aa   : > { %v3088_v60 = vpop.eup %3087 }
 0x5ab   : > { %v3090_v7 = vpop.eup %3089  ;;  %v3847_v32 = vsel %vm516_vm3, %v3088_v60, %v1640_v30  ;;  %v1734_v33 = vadd.f32 %v1733_v23, %v1732_v53  ;;  %v1682_v34 = vadd.f32 %v1681_v31, %v1680_v15 }
 0x5ac   : > { %v1683_v35 = vsel %vm846_vm0, %v3847_v32, 0.0  ;;  %v1710_v36 = vmul.f32 %v3847_v32, %v3847_v32  ;;  %v3092_v58 = vpop.eup %3091  ;;  %v3856_v38 = vsel %vm516_vm3, %v3090_v7, %v1642_v18 }
 0x5ad   : > { %v1684_v63 = vadd.f32 %v1683_v35, %v1682_v34  ;;  %v1736_v39 = vadd.f32 %v1735_v43, %v1734_v33  ;;  %v3094_v1 = vpop.eup %3093  ;;  %v3861_v8 = vsel %vm516_vm3, %v3092_v58, %v1643_v49  ;;  %v1712_v62 = vmul.f32 %v3856_v38, %v3856_v38 }
 0x5ae   : > { %v1737_v51 = vsel %vm846_vm0, %v1710_v36, 0.0  ;;  %v1657_v3 = vsel %vm516_vm3, %v3094_v1, %v1641_v57  ;;  %v1687_v4 = vsel %vm846_vm0, %v3856_v38, 0.0  ;;  %v1713_v13 = vmul.f32 %v3861_v8, %v3861_v8 }
 0x5af   : > { %v1738_v2 = vadd.f32 %v1737_v51, %v1736_v39  ;;  %v1685_v6 = vsel %vm846_vm0, %v1657_v3, 0.0  ;;  %v1711_v17 = vmul.f32 %v1657_v3, %v1657_v3  ;;  %v1741_v26 = vsel %vm846_vm0, %v1712_v62, 0.0 }
 0x5b0   : > { %v1686_v10 = vadd.f32 %v1685_v6, %v1684_v63  ;;  %v1689_v46 = vsel %vm846_vm0, %v3861_v8, 0.0  ;;  %v1743_v25 = vsel %vm846_vm0, %v1713_v13, 0.0 }
 0x5b1   : > { %v1739_v5 = vsel %vm846_vm0, %v1711_v17, 0.0 }
 0x5b2   : > { %v1688_v11 = vadd.f32 %v1687_v4, %v1686_v10  ;;  %v1740_v16 = vadd.f32 %v1739_v5, %v1738_v2 }
 0x5b4   : > { %v1690_v55 = vadd.f32 %v1689_v46, %v1688_v11  ;;  %v1742_v9 = vadd.f32 %v1741_v26, %v1740_v16 }
 0x5b6   : > { %v1691_v44 = vrot.slane %v1690_v55, 4  ;;  %v1744_v20 = vadd.f32 %v1743_v25, %v1742_v9 }
 0x5b8   : > { %v1692_v27 = vadd.f32 %v1691_v44, %v1690_v55  ;;  %v1745_v28 = vrot.slane %v1744_v20, 4 }
 0x5ba   : > { %v1693_v14 = vrot.slane %v1692_v27, 2  ;;  %v1746_v24 = vadd.f32 %v1745_v28, %v1744_v20 }
 0x5bc   : > { %v1694_v29 = vadd.f32 %v1693_v14, %v1692_v27  ;;  %v1747_v37 = vrot.slane %v1746_v24, 2 }
 0x5be   : > { %v1695_v40 = vrot.slane %v1694_v29, 1  ;;  %v1748_v30 = vadd.f32 %v1747_v37, %v1746_v24  ;;  %v3133_v24 = vld [vmem:[%s3243_s18 + $0x18] sm:$0xff]   ;;  %v3135_v37 = vld [vmem:[%s3243_s18 + $0x28] sm:$0xff]  }
 0x5c0   : > { %v1696_v60 = vadd.f32 %v1695_v40, %v1694_v29  ;;  %v1749_v15 = vrot.slane %v1748_v30, 1  ;;  %v3134_v29 = vld [vmem:[%s3243_s18 + $0x20] sm:$0xff]   ;;  %v3136_v40 = vld [vmem:[%s3243_s18 + $0x30] sm:$0xff]  }
 0x5c2   : > { %v1697_v53 = vmul.f32 0.0078125, %v1696_v60  ;;  %v1750_v7 = vadd.f32 %v1749_v15, %v1748_v30  ;;  %v3137_v30 = vld [vmem:[%s3243_s18 + $0x38] sm:$0xff]   ;;  %v3048_v60 = vld [vmem:[%s4248_s5 + $0x80] sm:$0xff]   ;;  %v3049_v15 = vld [vmem:[%s4248_s5 + $0x88] sm:$0xff]  }
 0x5c3   : > { %2946 = vmatprep.subr.bf16.mxu1 %v3048_v60 }
 0x5c4   : > { %v1751_v23 = vmul.f32 0.0078125, %v1750_v7  ;;  %v1752_v31 = vmul.f32 %v1697_v53, %v1697_v53  ;;  %2947 = vmatpush3.bf16.msra.mxu1 %v3048_v60  ;;  %v3051_v7 = vld [vmem:[%s4248_s5 + $0x98] sm:$0xff]  }
 0x5c5   : > { %2948 = vmatprep.subr.bf16.mxu1 %v3049_v15 }
 0x5c6   : > { %v1753_v18 = vsub.f32 %v1751_v23, %v1752_v31  ;;  %v3052_v23 = vld [vmem:[%s4248_s5 + $0xa0] sm:$0xff]   ;;  %v3053_v31 = vld [vmem:[%s4248_s5 + $0xa8] sm:$0xff]  }
 0x5c8   : > { %v1754_v33 = vmax.f32 %v1753_v18, 0.0  ;;  %2949 = vmatpush3.bf16.msra.mxu1 %v3049_v15  ;;  %v3054_v18 = vld [vmem:[%s4248_s5 + $0xb0] sm:$0xff]  }
 0x5c9   : > { %v3059_v15 = vld [vmem:[%s4252_s9 + $0x10] sm:$0xff]  }
 0x5ca   : > { %v1755_v34 = vadd.f32 1e-05, %v1754_v33  ;;  %v3055_v33 = vld [vmem:[%s4248_s5 + $0xb8] sm:$0xff]  }
 0x5cc   : > { %3095 = vrsqrt.f32 %v1755_v34 }
 0x5d6   : > { %v3096_v35 = vpop.eup %3095 }
 0x5d7   : > { %v1757_v36 = vmul.f32 %v3096_v35, %v3588_v52 }
 0x5d9   : > { %v1758_v43 = vmul.f32 %v1757_v36, %v1697_v53  ;;  %v1764_v49 = vrot.slane %v1757_v36, %v3590_v50  ;;  %v3050_v53 = vld [vmem:[%s4248_s5 + $0x90] sm:$0xff]  }
 0x5da   : > { %2950 = vmatprep.subr.bf16.mxu1 %v3050_v53 }
 0x5db   : > { %v1759_v57 = vsub.f32 %v3596_v59, %v1758_v43  ;;  %v1766_v58 = vmul.f32 %v1764_v49, %v3724_v48  ;;  %v1767_v63 = vmul.f32 %v1764_v49, %v3736_v54  ;;  %v1768_v39 = vmul.f32 %v1764_v49, %v3720_v19  ;;  %2951 = vmatpush3.bf16.msra.mxu1 %v3050_v53 }
 0x5dc   : > { %v1769_v51 = vmul.f32 %v1764_v49, %v3730_v61  ;;  %v1770_v1 = vmul.f32 %v1764_v49, %v3771_v45  ;;  %v1771_v2 = vmul.f32 %v1764_v49, %v3785_v22  ;;  %v1772_v62 = vmul.f32 %v1764_v49, %v3767_v47  ;;  %2952 = vmatprep.subr.bf16.mxu1 %v3051_v7 }
 0x5dd   : > { %v1786_v52 = vrot.slane %v1759_v57, %v3590_v50  ;;  %v1773_v6 = vmul.f32 %v1764_v49, %v3780_v41  ;;  %v1774_v59 = vmul.f32 %v1764_v49, %v3808_v12  ;;  %v1775_v48 = vmul.f32 %v1764_v49, %v3829_v56 }
 0x5de   : > { %v1776_v54 = vmul.f32 %v1764_v49, %v3820_v0  ;;  %v1777_v19 = vmul.f32 %v1764_v49, %v3825_v21  ;;  %v1778_v61 = vmul.f32 %v1764_v49, %v3847_v32  ;;  %v1779_v17 = vmul.f32 %v1764_v49, %v1657_v3 }
 0x5df   : > { %v1788_v45 = vadd.f32 %v1786_v52, %v1766_v58  ;;  %v1789_v10 = vadd.f32 %v1786_v52, %v1767_v63  ;;  %v1790_v22 = vadd.f32 %v1786_v52, %v1768_v39  ;;  %v1791_v4 = vadd.f32 %v1786_v52, %v1769_v51  ;;  %2953 = vmatpush3.bf16.msra.mxu1 %v3051_v7 }
 0x5e0   : > { %v1792_v47 = vadd.f32 %v1786_v52, %v1770_v1  ;;  %v1793_v13 = vadd.f32 %v1786_v52, %v1771_v2  ;;  %v1794_v5 = vadd.f32 %v1786_v52, %v1772_v62  ;;  %v1795_v11 = vadd.f32 %v1786_v52, %v1773_v6  ;;  %2954 = vmatprep.subr.bf16.mxu1 %v3052_v23 }
 0x5e1   : > { %v3894_v41 = vpack.c.bf16 %v1789_v10, %v1788_v45  ;;  %v3896_v12 = vpack.c.bf16 %v1791_v4, %v1790_v22  ;;  %v1796_v56 = vadd.f32 %v1786_v52, %v1774_v59  ;;  %v1797_v16 = vadd.f32 %v1786_v52, %v1775_v48 }
 0x5e2   : > { %v3898_v0 = vpack.c.bf16 %v1793_v13, %v1792_v47  ;;  %v3900_v21 = vpack.c.bf16 %v1795_v11, %v1794_v5  ;;  %v1798_v32 = vadd.f32 %v1786_v52, %v1776_v54  ;;  %v1799_v3 = vadd.f32 %v1786_v52, %v1777_v19 }
 0x5e3   : > { %2914 = vmatprep.subr.bf16.mxu0 %v3894_v41  ;;  %v3903_v26 = vpack.c.bf16 %v1797_v16, %v1796_v56  ;;  %v1800_v46 = vadd.f32 %v1786_v52, %v1778_v61  ;;  %v1801_v55 = vadd.f32 %v1786_v52, %v1779_v17  ;;  %v1780_v9 = vmul.f32 %v1764_v49, %v3856_v38  ;;  %v3131_v38 = vld [vmem:[%s3243_s18 + $0x8] sm:$0xff]  }
 0x5e4   : > { %2915 = vmatpush3.bf16.msra.mxu0 %v3894_v41  ;;  %v3907_v25 = vpack.c.bf16 %v1799_v3, %v1798_v32  ;;  %v1781_v44 = vmul.f32 %v1764_v49, %v3861_v8  ;;  %v3132_v8 = vld [vmem:[%s3243_s18 + $0x10] sm:$0xff]   ;;  %2955 = vmatpush3.bf16.msra.mxu1 %v3052_v23 }
 0x5e5   : > { %2916 = vmatprep.subr.bf16.mxu0 %v3896_v12  ;;  %v3911_v20 = vpack.c.bf16 %v1801_v55, %v1800_v46  ;;  %v1802_v27 = vadd.f32 %v1786_v52, %v1780_v9  ;;  %2956 = vmatprep.subr.bf16.mxu1 %v3053_v31 }
 0x5e6   : > { %v1803_v28 = vadd.f32 %v1786_v52, %v1781_v44  ;;  %v3150_v44 = vmov 0.0  }
 0x5e8   : > { %2917 = vmatpush3.bf16.msra.mxu0 %v3896_v12  ;;  %v3914_v14 = vpack.c.bf16 %v1803_v28, %v1802_v27  ;;  %2957 = vmatpush3.bf16.msra.mxu1 %v3053_v31 }
 0x5e9   : > { %2918 = vmatprep.subr.bf16.mxu0 %v3898_v0  ;;  %2958 = vmatprep.subr.bf16.mxu1 %v3054_v18 }
 0x5ec   : > { %2919 = vmatpush3.bf16.msra.mxu0 %v3898_v0  ;;  %2959 = vmatpush3.bf16.msra.mxu1 %v3054_v18 }
 0x5ed   : > { %2920 = vmatprep.subr.bf16.mxu0 %v3900_v21  ;;  %2960 = vmatprep.subr.bf16.mxu1 %v3055_v33 }
 0x5f0   : > { %2921 = vmatpush3.bf16.msra.mxu0 %v3900_v21  ;;  %2961 = vmatpush3.bf16.msra.mxu1 %v3055_v33 }
 0x5f1   : > { %2922 = vmatprep.subr.bf16.mxu0 %v3903_v26  ;;  %2998 = vmatprep.subr.bf16.mxu1 %v3150_v44 }
 0x5f4   : > { %2923 = vmatpush3.bf16.msra.mxu0 %v3903_v26 }
 0x5f5   : > { %2924 = vmatprep.subr.bf16.mxu0 %v3907_v25 }
 0x5f8   : > { %2925 = vmatpush3.bf16.msra.mxu0 %v3907_v25 }
 0x5f9   : > { %2926 = vmatprep.subr.bf16.mxu0 %v3911_v20 }
 0x5fc   : > { %2927 = vmatpush3.bf16.msra.mxu0 %v3911_v20 }
 0x5fd   : > { %2928 = vmatprep.subr.bf16.mxu0 %v3914_v14 }
 0x600   : > { %2929 = vmatpush3.bf16.msra.mxu0 %v3914_v14 }
 0x601   : > { %2978 = vmatprep.subr.bf16.mxu0 %v3150_v44 }
 0x603   : > { %2931 = vmatmul.mubr.bf16.vlgmr.msra.gmra.mrb[32].mxu0 %v3131_v38 }
 0x604   : > { %2934 = vmatprep.mubr.bf16.mxu0 %v3132_v8 }
 0x60b   : > { %2935 = vmatmul.mubr.bf16.gmra.mrb[36].mxu0 %v3133_v24  ;;  %v3057_v24 = vld [vmem:[%s4252_s9] sm:$0xff]  }
 0x60c   : > { %2938 = vmatprep.mubr.bf16.mxu0 %v3134_v29 }
 0x613   : > { %2939 = vmatmul.mubr.bf16.gmra.mrb[40].mxu0 %v3135_v37  ;;  %v3058_v37 = vld [vmem:[%s4252_s9 + $0x8] sm:$0xff]  }
 0x614   : > { %2942 = vmatprep.mubr.bf16.mxu0 %v3136_v40 }
 0x61b   : > { %2943 = vmatmul.mubr.bf16.gmra.mrb[44].mxu0 %v3137_v30 }
 0x61c   : > { %2994 = vmatprep.mubr.msk.bf16.mxu0 %vm3151_vm4, %v3150_v44 }
 0x6d6   : > { %v2932_v34 = vpop.f32.mrb[32].mxu0 }
 0x6d7   : > { %v1846_v35 = vpop.f32.mrb[33].mxu0 }
 0x6d8   : > { %v2933_v36 = vpop.f32.mrb[34].mxu0 }
 0x6d9   : > { %v1910_v43 = vpack.c.bf16 %v2933_v36, %v2932_v34  ;;  %v1849_v49 = vpop.f32.mrb[35].mxu0  ;;  %v3060_v36 = vld [vmem:[%s4252_s9 + $0x18] sm:$0xff]  }
 0x6da   : > { %v1909_v57 = vpack.c.bf16 %v1849_v49, %v1846_v35 }
 0x6db   : > { %1927 = vrot.lane.b32.xlu1 %v1910_v43, %s3149_s24 }
 0x6dc   : > { %1925 = vrot.lane.b32.xlu0 %v1909_v57, %s3149_s24 }
 0x6de   : > { %v2936_v58 = vpop.f32.mrb[36].mxu0 }
 0x6df   : > { %v1862_v63 = vpop.f32.mrb[37].mxu0 }
 0x6e0   : > { %v2937_v39 = vpop.f32.mrb[38].mxu0 }
 0x6e1   : > { %v1912_v51 = vpack.c.bf16 %v2937_v39, %v2936_v58  ;;  %v1865_v1 = vpop.f32.mrb[39].mxu0 }
 0x6e2   : > { %v1911_v2 = vpack.c.bf16 %v1865_v1, %v1862_v63 }
 0x6e3   : > { %1931 = vrot.lane.b32.xlu1 %v1912_v51, %s3149_s24 }
 0x6e4   : > { %1929 = vrot.lane.b32.xlu0 %v1911_v2, %s3149_s24 }
 0x6e6   : > { %v2940_v62 = vpop.f32.mrb[40].mxu0 }
 0x6e7   : > { %v1878_v52 = vpop.f32.mrb[41].mxu0 }
 0x6e8   : > { %v2941_v6 = vpop.f32.mrb[42].mxu0 }
 0x6e9   : > { %v1914_v59 = vpack.c.bf16 %v2941_v6, %v2940_v62  ;;  %v1881_v48 = vpop.f32.mrb[43].mxu0 }
 0x6ea   : > { %v1913_v54 = vpack.c.bf16 %v1881_v48, %v1878_v52 }
 0x6eb   : > { %1935 = vrot.lane.b32.xlu1 %v1914_v59, %s3149_s24 }
 0x6ec   : > { %1933 = vrot.lane.b32.xlu0 %v1913_v54, %s3149_s24 }
 0x6ee   : > { %v2944_v19 = vpop.f32.mrb[44].mxu0 }
 0x6ef   : > { %v1894_v61 = vpop.f32.mrb[45].mxu0 }
 0x6f0   : > { %v2945_v17 = vpop.f32.mrb[46].mxu0 }
 0x6f1   : > { %v1916_v45 = vpack.c.bf16 %v2945_v17, %v2944_v19  ;;  %v1897_v10 = vpop.f32.mrb[47].mxu0 }
 0x6f2   : > { %v1915_v22 = vpack.c.bf16 %v1897_v10, %v1894_v61 }
 0x6f3   : > { %1939 = vrot.lane.b32.xlu1 %v1916_v45, %s3149_s24 }
 0x6f4   : > { %1937 = vrot.lane.b32.xlu0 %v1915_v22, %s3149_s24 }
 0x74d   : > { %v1928_v4 = vpop.permute.xlu1 %1927 }
 0x74e   : > { %v1926_v47 = vpop.permute.xlu0 %1925  ;;  %v1947_v5 = vsel %vm846_vm0, %v3896_v12, %v1928_v4 }
 0x74f   : > { %v1943_v13 = vsel %vm846_vm0, %v3894_v41, %v1926_v47 }
 0x750   : > { %2962 = vmatprep.mubr.bf16.mxu1 %v1943_v13 }
 0x751   : > { %2963 = vmatmul.mubr.bf16.vlgmr.msra.gmra.mrb[32].mxu1 %v1947_v5 }
 0x752   : > { %2999 = vmatpush3.bf16.msra.mxu1 %v3057_v24 }
 0x753   : > { %3000 = vmatprep.subr.bf16.mxu1 %v3150_v44 }
 0x755   : > { %v1932_v11 = vpop.permute.xlu1 %1931 }
 0x756   : > { %v1930_v56 = vpop.permute.xlu0 %1929  ;;  %v1955_v32 = vsel %vm846_vm0, %v3900_v21, %v1932_v11  ;;  %3001 = vmatpush3.bf16.msra.mxu1 %v3058_v37 }
 0x757   : > { %v1951_v16 = vsel %vm846_vm0, %v3898_v0, %v1930_v56  ;;  %3002 = vmatprep.subr.bf16.mxu1 %v3150_v44 }
 0x758   : > { %2966 = vmatprep.mubr.bf16.mxu1 %v1951_v16 }
 0x759   : > { %2967 = vmatmul.mubr.bf16.gmra.mrb[36].mxu1 %v1955_v32 }
 0x75a   : > { %3003 = vmatpush3.bf16.msra.mxu1 %v3059_v15 }
 0x75b   : > { %3004 = vmatprep.subr.bf16.mxu1 %v3150_v44 }
 0x75d   : > { %v1936_v3 = vpop.permute.xlu1 %1935 }
 0x75e   : > { %v1934_v46 = vpop.permute.xlu0 %1933  ;;  %v1963_v12 = vsel %vm846_vm0, %v3907_v25, %v1936_v3  ;;  %3005 = vmatpush3.bf16.msra.mxu1 %v3060_v36 }
 0x75f   : > { %v1959_v41 = vsel %vm846_vm0, %v3903_v26, %v1934_v46  ;;  %v3988_v26 = vld [vmem:[%s4249_s6 + $0x2] ss:$0 sm:$0xff] }
 0x760   : > { %2970 = vmatprep.mubr.bf16.mxu1 %v1959_v41 }
 0x761   : > { %2971 = vmatmul.mubr.bf16.gmra.mrb[40].mxu1 %v1963_v12 }
 0x765   : > { %v1940_v55 = vpop.permute.xlu1 %1939 }
 0x766   : > { %v1938_v9 = vpop.permute.xlu0 %1937  ;;  %v1971_v21 = vsel %vm846_vm0, %v3914_v14, %v1940_v55 }
 0x767   : > { %v1967_v0 = vsel %vm846_vm0, %v3911_v20, %v1938_v9 }
 0x768   : > { %2974 = vmatprep.mubr.bf16.mxu1 %v1967_v0 }
 0x769   : > { %2975 = vmatmul.mubr.bf16.gmra.mrb[44].mxu1 %v1971_v21 }
 0x76a   : > { %3006 = vmatprep.mubr.msk.bf16.mxu1 %vm3151_vm4, %v3150_v44 }
 0x824   : > { %v2964_v25 = vpop.f32.mrb[32].mxu1 }
 0x825   : > { %v2089_v27 = vadd.f32 %v2964_v25, %v3988_v26  ;;  %v2080_v20 = vpop.f32.mrb[33].mxu1 }
 0x826   : > { %v2081_v28 = vadd.f32 %v3988_v26, %v2080_v20  ;;  %v2965_v14 = vpop.f32.mrb[34].mxu1 }
 0x827   : > { %3097 = vtanh.f32 %v2089_v27  ;;  %v2092_v38 = vadd.f32 %v2965_v14, %v3988_v26  ;;  %v2083_v8 = vpop.f32.mrb[35].mxu1  ;;  %v2145_v18 = vmax.f32 %v2089_v27, 0.0 }
 0x828   : > { %3099 = vtanh.f32 %v2081_v28  ;;  %v2084_v29 = vadd.f32 %v3988_v26, %v2083_v8  ;;  %v2143_v35 = vmax.f32 %v2081_v28, 0.0 }
 0x829   : > { %3101 = vtanh.f32 %v2092_v38  ;;  %v2146_v57 = vmax.f32 %v2092_v38, 0.0 }
 0x82a   : > { %3103 = vtanh.f32 %v2084_v29  ;;  %v2144_v39 = vmax.f32 %v2084_v29, 0.0 }
 0x82c   : > { %v2968_v40 = vpop.f32.mrb[36].mxu1 }
 0x82d   : > { %v4012_v30 = vadd.f32 %v2968_v40, %v3988_v26  ;;  %v2096_v60 = vpop.f32.mrb[37].mxu1 }
 0x82e   : > { %v2097_v53 = vadd.f32 %v3988_v26, %v2096_v60  ;;  %v2969_v7 = vpop.f32.mrb[38].mxu1 }
 0x82f   : > { %3105 = vtanh.f32 %v4012_v30  ;;  %v4021_v23 = vadd.f32 %v2969_v7, %v3988_v26  ;;  %v2099_v31 = vpop.f32.mrb[39].mxu1  ;;  %v2149_v59 = vmax.f32 %v4012_v30, 0.0 }
 0x830   : > { %3107 = vtanh.f32 %v2097_v53  ;;  %v4024_v33 = vadd.f32 %v3988_v26, %v2099_v31  ;;  %v2147_v48 = vmax.f32 %v2097_v53, 0.0 }
 0x831   : > { %v3098_v34 = vpop.eup %3097  ;;  %3109 = vtanh.f32 %v4021_v23  ;;  %v2150_v47 = vmax.f32 %v4021_v23, 0.0 }
 0x832   : > { %v3100_v43 = vpop.eup %3099  ;;  %v4032_v49 = vsel %vm516_vm3, %v2145_v18, %v3098_v34  ;;  %3111 = vtanh.f32 %v4024_v33  ;;  %v2148_v12 = vmax.f32 %v4024_v33, 0.0 }
 0x833   : > { %v3102_v58 = vpop.eup %3101  ;;  %v4038_v63 = vsel %vm516_vm3, %v2143_v35, %v3100_v43  ;;  %v2231_v52 = vmul.f32 %v4032_v49, %v4032_v49  ;;  %v2194_v11 = vsel %vm846_vm0, %v4032_v49, 0.0 }
 0x834   : > { %v3104_v51 = vpop.eup %3103  ;;  %v2229_v1 = vmul.f32 %v4038_v63, %v4038_v63  ;;  %v4044_v2 = vsel %vm516_vm3, %v2146_v57, %v3102_v58  ;;  %v2972_v62 = vpop.f32.mrb[40].mxu1  ;;  %v2191_v19 = vsel %vm846_vm0, %v4038_v63, 0.0 }
 0x835   : > { %v4050_v6 = vsel %vm516_vm3, %v2144_v39, %v3104_v51  ;;  %v2112_v54 = vpop.f32.mrb[41].mxu1  ;;  %v4060_v45 = vadd.f32 %v2972_v62, %v3988_v26  ;;  %v2232_v22 = vmul.f32 %v4044_v2, %v4044_v2  ;;  %v2248_v9 = vsel %vm846_vm0, %v2231_v52, 0.0 }
 0x836   : > { %v2192_v61 = vsel %vm846_vm0, %v4050_v6, 0.0  ;;  %v2230_v17 = vmul.f32 %v4050_v6, %v4050_v6  ;;  %v2973_v10 = vpop.f32.mrb[42].mxu1  ;;  %v2113_v13 = vadd.f32 %v3988_v26, %v2112_v54  ;;  %v2245_v56 = vsel %vm846_vm0, %v2229_v1, 0.0 }
 0x837   : > { %v2193_v4 = vadd.f32 %v2192_v61, %v2191_v19  ;;  %v2115_v5 = vpop.f32.mrb[43].mxu1  ;;  %v4071_v32 = vadd.f32 %v2973_v10, %v3988_v26  ;;  %v2196_v0 = vsel %vm846_vm0, %v4044_v2, 0.0  ;;  %v2250_v27 = vsel %vm846_vm0, %v2232_v22, 0.0 }
 0x838   : > { %v2246_v16 = vsel %vm846_vm0, %v2230_v17, 0.0  ;;  %3113 = vtanh.f32 %v2113_v13  ;;  %v4079_v21 = vadd.f32 %v3988_v26, %v2115_v5  ;;  %v2153_v52 = vmax.f32 %v4060_v45, 0.0 }
 0x839   : > { %v3106_v3 = vpop.eup %3105  ;;  %v2195_v46 = vadd.f32 %v2194_v11, %v2193_v4  ;;  %v2247_v41 = vadd.f32 %v2246_v16, %v2245_v56  ;;  %3115 = vtanh.f32 %v4060_v45  ;;  %v2154_v16 = vmax.f32 %v4071_v32, 0.0 }
 0x83a   : > { %v3108_v55 = vpop.eup %3107  ;;  %v4084_v28 = vsel %vm516_vm3, %v2149_v59, %v3106_v3  ;;  %3117 = vtanh.f32 %v4071_v32  ;;  %v2151_v59 = vmax.f32 %v2113_v13, 0.0  ;;  %v2152_v3 = vmax.f32 %v4079_v21, 0.0 }
 0x83b   : > { %v3110_v25 = vpop.eup %3109  ;;  %v2249_v20 = vadd.f32 %v2248_v9, %v2247_v41  ;;  %v4088_v14 = vsel %vm516_vm3, %v2147_v48, %v3108_v55  ;;  %v2197_v8 = vadd.f32 %v2196_v0, %v2195_v46  ;;  %3119 = vtanh.f32 %v4079_v21 }
 0x83c   : > { %v3112_v38 = vpop.eup %3111  ;;  %v2198_v24 = vsel %vm846_vm0, %v4088_v14, 0.0  ;;  %v2233_v29 = vmul.f32 %v4088_v14, %v4088_v14  ;;  %v2976_v37 = vpop.f32.mrb[44].mxu1  ;;  %v4097_v30 = vsel %vm516_vm3, %v2150_v47, %v3110_v25  ;;  %v2235_v31 = vmul.f32 %v4084_v28, %v4084_v28 }
 0x83d   : > { %v2251_v40 = vadd.f32 %v2250_v27, %v2249_v20  ;;  %v2128_v60 = vpop.f32.mrb[45].mxu1  ;;  %v2199_v15 = vadd.f32 %v2198_v24, %v2197_v8  ;;  %v4102_v7 = vsel %vm516_vm3, %v2148_v12, %v3112_v38  ;;  %v2137_v43 = vadd.f32 %v2976_v37, %v3988_v26 }
 0x83e   : > { %v2252_v53 = vsel %vm846_vm0, %v2233_v29, 0.0  ;;  %v2977_v23 = vpop.f32.mrb[46].mxu1  ;;  %v2200_v33 = vsel %vm846_vm0, %v4102_v7, 0.0  ;;  %v2234_v34 = vmul.f32 %v4102_v7, %v4102_v7  ;;  %v2129_v57 = vadd.f32 %v3988_v26, %v2128_v60 }
 0x83f   : > { %v2253_v18 = vadd.f32 %v2252_v53, %v2251_v40  ;;  %v2131_v35 = vpop.f32.mrb[47].mxu1  ;;  %v2201_v36 = vadd.f32 %v2200_v33, %v2199_v15  ;;  %v2202_v58 = vsel %vm846_vm0, %v4084_v28, 0.0  ;;  %v2236_v39 = vmul.f32 %v4097_v30, %v4097_v30 }
 0x840   : > { %v2254_v51 = vsel %vm846_vm0, %v2234_v34, 0.0  ;;  %v2256_v54 = vsel %vm846_vm0, %v2235_v31, 0.0  ;;  %v2204_v19 = vsel %vm846_vm0, %v4097_v30, 0.0  ;;  %3121 = vtanh.f32 %v2129_v57 }
 0x841   : > { %v2203_v1 = vadd.f32 %v2202_v58, %v2201_v36  ;;  %v2255_v62 = vadd.f32 %v2254_v51, %v2253_v18  ;;  %v2140_v61 = vadd.f32 %v2977_v23, %v3988_v26  ;;  %3123 = vtanh.f32 %v2137_v43 }
 0x842   : > { %v3114_v48 = vpop.eup %3113  ;;  %v2132_v4 = vadd.f32 %v3988_v26, %v2131_v35  ;;  %v2258_v45 = vsel %vm846_vm0, %v2236_v39, 0.0  ;;  %v2155_v24 = vmax.f32 %v2129_v57, 0.0  ;;  %v2157_v23 = vmax.f32 %v2137_v43, 0.0 }
 0x843   : > { %v3116_v17 = vpop.eup %3115  ;;  %v2257_v10 = vadd.f32 %v2256_v54, %v2255_v62  ;;  %v4125_v22 = vsel %vm516_vm3, %v2151_v59, %v3114_v48  ;;  %v2205_v47 = vadd.f32 %v2204_v19, %v2203_v1  ;;  %3125 = vtanh.f32 %v2140_v61 }
 0x844   : > { %v2206_v13 = vsel %vm846_vm0, %v4125_v22, 0.0  ;;  %v2237_v5 = vmul.f32 %v4125_v22, %v4125_v22  ;;  %v3118_v11 = vpop.eup %3117  ;;  %v4137_v46 = vsel %vm516_vm3, %v2153_v52, %v3116_v17  ;;  %3127 = vtanh.f32 %v2132_v4 }
 0x845   : > { %v2259_v56 = vadd.f32 %v2258_v45, %v2257_v10  ;;  %v2207_v26 = vadd.f32 %v2206_v13, %v2205_v47  ;;  %v3120_v12 = vpop.eup %3119  ;;  %v4142_v9 = vsel %vm516_vm3, %v2154_v16, %v3118_v11  ;;  %v2239_v0 = vmul.f32 %v4137_v46, %v4137_v46 }
 0x846   : > { %v2260_v41 = vsel %vm846_vm0, %v2237_v5, 0.0  ;;  %v4146_v32 = vsel %vm516_vm3, %v2152_v3, %v3120_v12  ;;  %v2210_v20 = vsel %vm846_vm0, %v4137_v46, 0.0  ;;  %v2240_v38 = vmul.f32 %v4142_v9, %v4142_v9 }
 0x847   : > { %v2261_v55 = vadd.f32 %v2260_v41, %v2259_v56  ;;  %v2208_v21 = vsel %vm846_vm0, %v4146_v32, 0.0  ;;  %v2238_v25 = vmul.f32 %v4146_v32, %v4146_v32  ;;  %v2264_v15 = vsel %vm846_vm0, %v2239_v0, 0.0 }
 0x848   : > { %v2209_v27 = vadd.f32 %v2208_v21, %v2207_v26  ;;  %v2212_v53 = vsel %vm846_vm0, %v4142_v9, 0.0  ;;  %v2266_v36 = vsel %vm846_vm0, %v2240_v38, 0.0  ;;  %v2158_v57 = vmax.f32 %v2140_v61, 0.0 }
 0x849   : > { %v2262_v8 = vsel %vm846_vm0, %v2238_v25, 0.0  ;;  %v2156_v58 = vmax.f32 %v2132_v4, 0.0 }
 0x84a   : > { %v3122_v29 = vpop.eup %3121  ;;  %v2211_v37 = vadd.f32 %v2210_v20, %v2209_v27  ;;  %v2263_v40 = vadd.f32 %v2262_v8, %v2261_v55 }
 0x84b   : > { %v3124_v60 = vpop.eup %3123  ;;  %v4164_v31 = vsel %vm516_vm3, %v2155_v24, %v3122_v29 }
 0x84c   : > { %v2265_v18 = vadd.f32 %v2264_v15, %v2263_v40  ;;  %v2213_v33 = vadd.f32 %v2212_v53, %v2211_v37  ;;  %v2214_v34 = vsel %vm846_vm0, %v4164_v31, 0.0  ;;  %v2241_v35 = vmul.f32 %v4164_v31, %v4164_v31 }
 0x84d   : > { %v3126_v39 = vpop.eup %3125  ;;  %v4173_v43 = vsel %vm516_vm3, %v2157_v23, %v3124_v60 }
 0x84e   : > { %v2215_v51 = vadd.f32 %v2214_v34, %v2213_v33  ;;  %v2267_v1 = vadd.f32 %v2266_v36, %v2265_v18  ;;  %v2268_v62 = vsel %vm846_vm0, %v2241_v35, 0.0  ;;  %v3128_v52 = vpop.eup %3127  ;;  %v4178_v48 = vsel %vm516_vm3, %v2158_v57, %v3126_v39  ;;  %v3138_v34 = vld [vmem:[%s4250_s7] sm:$0x1] }
 0x84f   : > { %v2188_v54 = vsel %vm516_vm3, %v2156_v58, %v3128_v52  ;;  %v2243_v19 = vmul.f32 %v4173_v43, %v4173_v43  ;;  %v2218_v4 = vsel %vm846_vm0, %v4173_v43, 0.0  ;;  %v2244_v45 = vmul.f32 %v4178_v48, %v4178_v48  ;;  %v3139_v58 = vld [vmem:[%s4251_s8] sm:$0x1] }
 0x850   : > { %v2269_v59 = vadd.f32 %v2268_v62, %v2267_v1  ;;  %v2216_v61 = vsel %vm846_vm0, %v2188_v54, 0.0  ;;  %v2242_v17 = vmul.f32 %v2188_v54, %v2188_v54  ;;  %v2220_v56 = vsel %vm846_vm0, %v4178_v48, 0.0 }
 0x851   : > { %v2217_v10 = vadd.f32 %v2216_v61, %v2215_v51  ;;  %v2272_v11 = vsel %vm846_vm0, %v2243_v19, 0.0  ;;  %v2274_v26 = vsel %vm846_vm0, %v2244_v45, 0.0 }
 0x852   : > { %v2270_v47 = vsel %vm846_vm0, %v2242_v17, 0.0 }
 0x853   : > { %v2219_v13 = vadd.f32 %v2218_v4, %v2217_v10  ;;  %v2271_v5 = vadd.f32 %v2270_v47, %v2269_v59 }
 0x855   : > { %v2221_v16 = vadd.f32 %v2220_v56, %v2219_v13  ;;  %v2273_v3 = vadd.f32 %v2272_v11, %v2271_v5 }
 0x857   : > { %v2222_v41 = vrot.slane %v2221_v16, 4  ;;  %v2275_v12 = vadd.f32 %v2274_v26, %v2273_v3 }
 0x859   : > { %v2223_v55 = vadd.f32 %v2222_v41, %v2221_v16  ;;  %v2276_v0 = vrot.slane %v2275_v12, 4 }
 0x85b   : > { %v2224_v21 = vrot.slane %v2223_v55, 2  ;;  %v2277_v25 = vadd.f32 %v2276_v0, %v2275_v12 }
 0x85d   : > { %v2225_v27 = vadd.f32 %v2224_v21, %v2223_v55  ;;  %v2278_v20 = vrot.slane %v2277_v25, 2 }
 0x85f   : > { %v2226_v38 = vrot.slane %v2225_v27, 1  ;;  %v2279_v8 = vadd.f32 %v2278_v20, %v2277_v25 }
 0x861   : > { %v2227_v24 = vadd.f32 %v2226_v38, %v2225_v27  ;;  %v2280_v29 = vrot.slane %v2279_v8, 1 }
 0x863   : > { %v2228_v37 = vmul.f32 0.0078125, %v2227_v24  ;;  %v2281_v40 = vadd.f32 %v2280_v29, %v2279_v8 }
 0x865   : > { %v2282_v60 = vmul.f32 0.0078125, %v2281_v40  ;;  %v2283_v15 = vmul.f32 %v2228_v37, %v2228_v37 }
 0x867   : > { %v2284_v53 = vsub.f32 %v2282_v60, %v2283_v15 }
 0x869   : > { %v2285_v23 = vmax.f32 %v2284_v53, 0.0  ;;  %v2669_v53 = vld [vmem:[%s4254_s11] ss:$0 sm:$0xff] }
 0x86b   : > { %v2286_v18 = vadd.f32 1e-05, %v2285_v23 }
 0x86d   : > { %3129 = vrsqrt.f32 %v2286_v18 }
 0x877   : > { %v3130_v33 = vpop.eup %3129 }
 0x878   : > { %v2288_v35 = vmul.f32 %v3138_v34, %v3130_v33  ;;  %v2670_v34 = vld [vmem:[#allocation2] ss:$0 sm:$0xff] }
 0x87a   : > { %v2289_v36 = vmul.f32 %v2288_v35, %v2228_v37  ;;  %v2295_v57 = vrot.slane %v2288_v35, %v3590_v50  ;;  %v2663_v37 = vld [vmem:[%s4253_s10] ss:$0 sm:$0xff] }
 0x87c   : > { %v2290_v39 = vsub.f32 %v3139_v58, %v2289_v36  ;;  %v2310_v51 = vmul.f32 %v2295_v57, %v2188_v54  ;;  %v2297_v1 = vmul.f32 %v2295_v57, %v4038_v63  ;;  %v2298_v62 = vmul.f32 %v2295_v57, %v4050_v6 }
 0x87d   : > { %v2299_v52 = vmul.f32 %v2295_v57, %v4032_v49  ;;  %v2300_v59 = vmul.f32 %v2295_v57, %v4044_v2  ;;  %v2301_v19 = vmul.f32 %v2295_v57, %v4088_v14  ;;  %v2302_v61 = vmul.f32 %v2295_v57, %v4102_v7 }
 0x87e   : > { %v2317_v17 = vrot.slane %v2290_v39, %v3590_v50  ;;  %v2303_v10 = vmul.f32 %v2295_v57, %v4084_v28  ;;  %v2304_v4 = vmul.f32 %v2295_v57, %v4097_v30  ;;  %v2305_v54 = vmul.f32 %v2295_v57, %v4125_v22 }
 0x87f   : > { %v2306_v63 = vmul.f32 %v2295_v57, %v4146_v32  ;;  %v2307_v6 = vmul.f32 %v2295_v57, %v4137_v46  ;;  %v2308_v49 = vmul.f32 %v2295_v57, %v4142_v9  ;;  %v2309_v2 = vmul.f32 %v2295_v57, %v4164_v31 }
 0x880   : > { %v2319_v45 = vadd.f32 %v2317_v17, %v2297_v1  ;;  %v2320_v14 = vadd.f32 %v2317_v17, %v2298_v62  ;;  %v2321_v47 = vadd.f32 %v2317_v17, %v2299_v52  ;;  %v2322_v7 = vadd.f32 %v2317_v17, %v2300_v59 }
 0x881   : > { %v2323_v13 = vadd.f32 %v2317_v17, %v2301_v19  ;;  %v2324_v50 = vadd.f32 %v2317_v17, %v2302_v61  ;;  %v2325_v5 = vadd.f32 %v2317_v17, %v2303_v10  ;;  %v2326_v28 = vadd.f32 %v2317_v17, %v2304_v4 }
 0x882   : > { %v2335_v11 = vpack.c.bf16 %v2320_v14, %v2319_v45  ;;  %v2336_v30 = vpack.c.bf16 %v2322_v7, %v2321_v47  ;;  %v2327_v56 = vadd.f32 %v2317_v17, %v2305_v54  ;;  %v2328_v22 = vadd.f32 %v2317_v17, %v2306_v63 }
 0x883   : > { %v2337_v16 = vpack.c.bf16 %v2324_v50, %v2323_v13  ;;  %v2338_v32 = vpack.c.bf16 %v2326_v28, %v2325_v5  ;;  %v2329_v3 = vadd.f32 %v2317_v17, %v2307_v6  ;;  %v2330_v46 = vadd.f32 %v2317_v17, %v2308_v49 }
 0x884   : > { %2979 = vmatpush3.bf16.msra.mxu0 %v2335_v11  ;;  %v2339_v9 = vpack.c.bf16 %v2328_v22, %v2327_v56  ;;  %v2331_v26 = vadd.f32 %v2317_v17, %v2309_v2  ;;  %v2332_v31 = vadd.f32 %v2317_v17, %v2310_v51  ;;  %v2311_v41 = vmul.f32 %v2295_v57, %v4173_v43  ;;  %v3056_v43 = vld [vmem:[%s3998_s26] sm:$0xff]  }
 0x885   : > { %2980 = vmatprep.subr.bf16.mxu0 %v3150_v44  ;;  %v2340_v12 = vpack.c.bf16 %v2330_v46, %v2329_v3  ;;  %v2312_v55 = vmul.f32 %v2295_v57, %v4178_v48 }
 0x886   : > { %v2341_v0 = vpack.c.bf16 %v2332_v31, %v2331_v26  ;;  %v2333_v21 = vadd.f32 %v2317_v17, %v2311_v41 }
 0x887   : > { %v2334_v25 = vadd.f32 %v2317_v17, %v2312_v55 }
 0x888   : > { %2981 = vmatpush3.bf16.msra.mxu0 %v2336_v30 }
 0x889   : > { %2982 = vmatprep.subr.bf16.mxu0 %v3150_v44  ;;  %v2342_v27 = vpack.c.bf16 %v2334_v25, %v2333_v21 }
 0x88c   : > { %2983 = vmatpush3.bf16.msra.mxu0 %v2337_v16 }
 0x88d   : > { %2984 = vmatprep.subr.bf16.mxu0 %v3150_v44 }
 0x890   : > { %2985 = vmatpush3.bf16.msra.mxu0 %v2338_v32 }
 0x891   : > { %2986 = vmatprep.subr.bf16.mxu0 %v3150_v44 }
 0x894   : > { %2987 = vmatpush3.bf16.msra.mxu0 %v2339_v9 }
 0x895   : > { %2988 = vmatprep.subr.bf16.mxu0 %v3150_v44 }
 0x898   : > { %2989 = vmatpush3.bf16.msra.mxu0 %v2340_v12 }
 0x899   : > { %2990 = vmatprep.subr.bf16.mxu0 %v3150_v44 }
 0x89c   : > { %2991 = vmatpush3.bf16.msra.mxu0 %v2341_v0 }
 0x89d   : > { %2992 = vmatprep.subr.bf16.mxu0 %v3150_v44 }
 0x8a0   : > { %2993 = vmatpush3.bf16.msra.mxu0 %v2342_v27 }
 0x8a3   : > { %2995 = vmatmul.mubr.bf16.vlgmr.msra.gmra.mrb[48].mxu0 %v3056_v43 }
 0x976   : > { %v2385_v48 = vpop.f32.mrb[48].mxu0 }
 0x977   : > { %v2996_v20 = vpop.f32.mrb[49].mxu0 }
 0x978   : > { %v2388_v38 = vpop.f32.mrb[50].mxu0 }
 0x979   : > { %v2392_v8 = vsel %vm516_vm3, %v2385_v48, %v2388_v38  ;;  %v2997_v24 = vpop.f32.mrb[51].mxu0 }
 0x97a   : > { %v2393_v29 = vpack.c.bf16 %v2392_v8, %v2392_v8 }
 0x97c   : > { %3007 = vmatmul.mubr.msk.bf16.vlgmr.msra.gmra.mrb[48].mxu1 %vm846_vm0, %v2393_v29 }
 0xa4f   : > { %v2470_v40 = vpop.f32.mrb[48].mxu1 }
 0xa50   : > { %v2471_v44 = vadd.f32 %v2663_v37, %v2470_v40  ;;  %v3008_v60 = vpop.f32.mrb[49].mxu1 }
 0xa51   : > { %v2473_v15 = vpop.f32.mrb[50].mxu1 }
 0xa52   : > { %v2476_v23 = vmax.f32 %v2471_v44, 0.0  ;;  %v3009_v42 = vpop.f32.mrb[51].mxu1 }
 0xa54   : > { %v2484_v18 = vmul.f32 %v2669_v53, %v2476_v23 }
 0xa56   : > { %v2485_v33 = vsel %vm846_vm0, %v2484_v18, 0.0 }
 0xa57   : > { %2486 = vadd.xlane.f32.xlu0 %v2485_v33 }
 0xae4   : > { %v2487_v35 = vpop.xlane.xlu0 %2486 }
 0xae5   : > { %v2495_v36 = vadd.f32 %v2670_v34, %v2487_v35 }
 0xae7   : > { %2498 = vperm.xlu1 %3023, %v2495_v36  }
 0xb66   : > { %v2499_v57 = vpop.permute.xlu1 %2498 }
 0xb67   : > { %2501 = vst [vmem:[%s480_s30] sm:$0xff] %v2499_v57 }
 0xb68 PF: > { %s25_s27 = sadd.s32 1, %s3146_s27  }
 0xb69   : > { %p22_p4 = scmp.ge.s32.totalorder %s25_s27, 4  }
 0xb6b   :  { %24 = sbr.rel (!%p22_p4) target bundleno = 3 (0x3), region = 112 }

</bundles_post_ra>
